<compile_context>
chip_gen: v6e
topology: v6e:2x2x1
jax: 0.10.0
libtpu: 0.0.40
codegen_flags: <defaults>
</compile_context>

<pallas_src>
import functools
import math

import jax
import jax.numpy as jnp
from jax.experimental import pallas as pl
from jax.experimental.pallas import tpu as pltpu


_MAX_UNROLL = 32   # fully unroll the in-kernel timestep loop up to this T


# ---------------------------------------------------------------------------
# Fused per-layer kernel: one grid step does the whole (T-step) layer.
#   GRU evolution (serial over t):
#     update = sigmoid(Wz W + Uz W + bz)
#     reset  = sigmoid(Wr W + Ur W + br)
#     h_cap  = tanh  (Wh W + Uh (reset*W) + bh)
#     W      = (1-update)*W + update*h_cap
#   GCN propagation (same t, immediately):
#     out_t  = act( A_t @ (X_t @ W) )       (association picked statically)
# Gate matmuls against W are fused into one (5*F_in, F_in) @ (F_in, F_out) push:
#   rows [0:F)=Wz@W [F:2F)=Wr@W [2F:3F)=Wh@W [3F:4F)=Uz@W [4F:5F)=Ur@W
# ---------------------------------------------------------------------------
def _egcn_layer_kernel(wu_ref, uh_ref, b_ref, w0_ref, a_ref, x_ref, out_ref,
                       *, T, F_in, F_out, leaky_slope, xw_first):
    # Hoist loop-invariant loads (params stay in vregs/VMEM across timesteps).
    WU = wu_ref[...]            # (5*F_in, F_in)
    Uh = uh_ref[...]            # (F_in, F_in)
    bz = b_ref[0]               # (F_in, F_out)
    br = b_ref[1]
    bh = b_ref[2]

    def evolve(W):
        pre = jnp.dot(WU, W, preferred_element_type=jnp.float32)   # (5*F_in, F_out)
        # NOTE: keep F_in a multiple of 8 so these slices stay on sublane
        # boundaries (true for feats = [8, 32, 16]).
        update = jax.nn.sigmoid(pre[0 * F_in:1 * F_in] + pre[3 * F_in:4 * F_in] + bz)
        reset = jax.nn.sigmoid(pre[1 * F_in:2 * F_in] + pre[4 * F_in:5 * F_in] + br)
        h_cap = jnp.tanh(pre[2 * F_in:3 * F_in]
                         + jnp.dot(Uh, reset * W, preferred_element_type=jnp.float32)
                         + bh)
        return (1.0 - update) * W + update * h_cap

    def propagate(A, X, W):
        if xw_first:   # F_out <= F_in: contract the N^2 matmul against F_out
            Y = jnp.dot(A, jnp.dot(X, W, preferred_element_type=jnp.float32),
                        preferred_element_type=jnp.float32)
        else:          # F_in < F_out: contract the N^2 matmul against F_in
            Y = jnp.dot(jnp.dot(A, X, preferred_element_type=jnp.float32), W,
                        preferred_element_type=jnp.float32)
        return jnp.where(Y >= 0.0, Y, leaky_slope * Y)

    def step(t, W):
        W = evolve(W)
        out_ref[t] = propagate(a_ref[t], x_ref[t], W)
        return W

    W = w0_ref[...]
    if T <= _MAX_UNROLL:
        for t in range(T):          # static unroll: full LLO scheduler visibility
            W = step(t, W)
    else:
        jax.lax.fori_loop(0, T, step, W)


def egcn_layer_forward(layer_p, A_all, X_all, *, leaky_slope):
    """One fused pallas_call for a whole GRCU layer (all T timesteps)."""
    T, N, _ = A_all.shape
    F_in = X_all.shape[-1]
    F_out = layer_p["GCN_init_weights"].shape[-1]
    xw_first = F_out <= F_in

    kernel = functools.partial(_egcn_layer_kernel, T=T, F_in=F_in, F_out=F_out,
                               leaky_slope=float(leaky_slope), xw_first=xw_first)

    return pl.pallas_call(
        kernel,
        out_shape=jax.ShapeDtypeStruct((T, N, F_out), jnp.float32),
        grid_spec=pltpu.PrefetchScalarGridSpec(
            num_scalar_prefetch=0,
            grid=(1,),   # single grid step: everything VMEM-resident, no per-t overhead
            in_specs=[
                pl.BlockSpec((5 * F_in, F_in), lambda i: (0, 0)),        # [Wz;Wr;Wh;Uz;Ur]
                pl.BlockSpec((F_in, F_in), lambda i: (0, 0)),            # Uh
                pl.BlockSpec((3, F_in, F_out), lambda i: (0, 0, 0)),     # [bz;br;bh]
                pl.BlockSpec((F_in, F_out), lambda i: (0, 0)),           # W_0 (initial)
                pl.BlockSpec((T, N, N), lambda i: (0, 0, 0)),            # A_all
                pl.BlockSpec((T, N, F_in), lambda i: (0, 0, 0)),         # X_all
            ],
            out_specs=pl.BlockSpec((T, N, F_out), lambda i: (0, 0, 0)),
        ),
        compiler_params=pltpu.CompilerParams(
            dimension_semantics=("arbitrary",)),
    )(layer_p["WU_stack"], layer_p["Uh"], layer_p["b_stack"],
      layer_p["GCN_init_weights"], A_all, X_all)


# ---------------------------------------------------------------------------
# Parameter construction (deterministic, mimics torch uniform(-stdv, stdv) init)
# ---------------------------------------------------------------------------
def _uniform(key, shape, stdv):
    return jax.random.uniform(key, shape, jnp.float32, minval=-stdv, maxval=stdv)


def init_egcn_params(key, feats):
    """feats = [feats_per_node, layer_1_feats, layer_2_feats]."""
    layers = []
    for i in range(1, len(feats)):
        fin, fout = feats[i - 1], feats[i]
        keys = jax.random.split(key, 8)
        key = keys[-1]
        stdv_gate = 1.0 / math.sqrt(fin)   # gate W/U are (fin, fin)
        stdv_gcn = 1.0 / math.sqrt(fout)   # GCN_init_weights is (fin, fout)
        Wz = _uniform(keys[0], (fin, fin), stdv_gate)
        Uz = _uniform(keys[1], (fin, fin), stdv_gate)
        Wr = _uniform(keys[2], (fin, fin), stdv_gate)
        Ur = _uniform(keys[3], (fin, fin), stdv_gate)
        Wh = _uniform(keys[4], (fin, fin), stdv_gate)
        Uh = _uniform(keys[5], (fin, fin), stdv_gate)
        bz = jnp.zeros((fin, fout), jnp.float32)
        br = jnp.zeros((fin, fout), jnp.float32)
        bh = jnp.zeros((fin, fout), jnp.float32)
        layer = {
            # stacked once at init so the kernel does one tall matmul per step
            "WU_stack": jnp.concatenate([Wz, Wr, Wh, Uz, Ur], axis=0),  # (5*fin, fin)
            "Uh": Uh,                                                   # (fin, fin)
            "b_stack": jnp.stack([bz, br, bh], axis=0),                 # (3, fin, fout)
            "GCN_init_weights": _uniform(keys[6], (fin, fout), stdv_gcn),
        }
        layers.append(layer)
    return {"layers": layers}


# ---------------------------------------------------------------------------
# EGCN forward (jitted; exactly one fused Pallas call per GRCU layer)
# ---------------------------------------------------------------------------
@functools.partial(jax.jit, static_argnames=("skipfeats", "leaky_slope"))
def egcn_forward(params, A_all, X_all, nodes_mask_list=None, skipfeats=False,
                 leaky_slope=0.0):
    # nodes_mask_list accepted but unused (EvolveGCN-O semantics).
    del nodes_mask_list
    node_feats = X_all[-1]
    X = X_all
    for layer_p in params["layers"]:
        X = egcn_layer_forward(layer_p, A_all, X, leaky_slope=leaky_slope)  # (T, N, fout)
    out = X[-1]
    if skipfeats:
        out = jnp.concatenate((out, node_feats), axis=1)
    return out


if __name__ == "__main__":
    key = jax.random.PRNGKey(0)

    # Small shapes consistent with the module:
    #   T=3 timesteps, N=16 nodes, feats: 8 -> 32 -> 16
    T, N = 3, 16
    feats = [8, 32, 16]

    k_param, k_a, k_x = jax.random.split(key, 3)
    params = init_egcn_params(k_param, feats)

    # Random row-normalized adjacency matrices, stacked to (T, N, N).
    a_keys = jax.random.split(k_a, T)
    A_list = []
    for t in range(T):
        A_raw = jax.random.uniform(a_keys[t], (N, N), jnp.float32)
        A_list.append(A_raw / jnp.sum(A_raw, axis=1, keepdims=True))
    A_all = jnp.stack(A_list, axis=0)

    # Node feature matrices per timestep, stacked to (T, N, F_in).
    x_keys = jax.random.split(k_x, T)
    X_all = jnp.stack(
        [jax.random.normal(x_keys[t], (N, feats[0]), jnp.float32) for t in range(T)],
        axis=0)

    out = egcn_forward(params, A_all, X_all, skipfeats=False)
    jax.block_until_ready(out)
    assert out.shape == (N, feats[-1]), out.shape
    print("KERNEL_OK")
</pallas_src>

<mosaic_0001>
module attributes {stable_mosaic.version = 11 : i64} {
  func.func @_egcn_layer_kernel(%arg0: i32, %arg1: memref<40x8xf32, #tpu.memory_space<vmem>>, %arg2: memref<8x8xf32, #tpu.memory_space<vmem>>, %arg3: memref<3x8x32xf32, #tpu.memory_space<vmem>>, %arg4: memref<8x32xf32, #tpu.memory_space<vmem>>, %arg5: memref<3x16x16xf32, #tpu.memory_space<vmem>>, %arg6: memref<3x16x8xf32, #tpu.memory_space<vmem>>, %arg7: memref<3x16x32xf32, #tpu.memory_space<vmem>>) attributes {dimension_semantics = [#tpu.dimension_semantics<arbitrary>], iteration_bounds = array<i64: 1>, scalar_prefetch = 0 : i64, scratch_operands = 0 : i64, tpu.core_type = #tpu.core_type<tc>, window_params = [{pipeline_mode = #tpu.pipeline_mode<synchronous>, transform_indices = @transform_0, window_bounds = array<i64: 40, 8>}, {pipeline_mode = #tpu.pipeline_mode<synchronous>, transform_indices = @transform_1, window_bounds = array<i64: 8, 8>}, {pipeline_mode = #tpu.pipeline_mode<synchronous>, transform_indices = @transform_2, window_bounds = array<i64: 3, 8, 32>}, {pipeline_mode = #tpu.pipeline_mode<synchronous>, transform_indices = @transform_3, window_bounds = array<i64: 8, 32>}, {pipeline_mode = #tpu.pipeline_mode<synchronous>, transform_indices = @transform_4, window_bounds = array<i64: 3, 16, 16>}, {pipeline_mode = #tpu.pipeline_mode<synchronous>, transform_indices = @transform_5, window_bounds = array<i64: 3, 16, 8>}, {pipeline_mode = #tpu.pipeline_mode<synchronous>, transform_indices = @transform_6, window_bounds = array<i64: 3, 16, 32>}]} {
    %c0 = arith.constant 0 : index
    %c0_0 = arith.constant 0 : index
    %0 = vector.load %arg1[%c0, %c0_0] : memref<40x8xf32, #tpu.memory_space<vmem>>, vector<40x8xf32>
    %c0_1 = arith.constant 0 : index
    %c0_2 = arith.constant 0 : index
    %1 = vector.load %arg2[%c0_1, %c0_2] : memref<8x8xf32, #tpu.memory_space<vmem>>, vector<8x8xf32>
    %c0_3 = arith.constant 0 : index
    %c0_4 = arith.constant 0 : index
    %c0_5 = arith.constant 0 : index
    %2 = vector.load %arg3[%c0_3, %c0_4, %c0_5] : memref<3x8x32xf32, #tpu.memory_space<vmem>>, vector<1x8x32xf32>
    %3 = vector.shape_cast %2 : vector<1x8x32xf32> to vector<8x32xf32>
    %c1 = arith.constant 1 : index
    %c0_6 = arith.constant 0 : index
    %c0_7 = arith.constant 0 : index
    %4 = vector.load %arg3[%c1, %c0_6, %c0_7] : memref<3x8x32xf32, #tpu.memory_space<vmem>>, vector<1x8x32xf32>
    %5 = vector.shape_cast %4 : vector<1x8x32xf32> to vector<8x32xf32>
    %c2 = arith.constant 2 : index
    %c0_8 = arith.constant 0 : index
    %c0_9 = arith.constant 0 : index
    %6 = vector.load %arg3[%c2, %c0_8, %c0_9] : memref<3x8x32xf32, #tpu.memory_space<vmem>>, vector<1x8x32xf32>
    %7 = vector.shape_cast %6 : vector<1x8x32xf32> to vector<8x32xf32>
    %c0_10 = arith.constant 0 : index
    %c0_11 = arith.constant 0 : index
    %8 = vector.load %arg4[%c0_10, %c0_11] : memref<8x32xf32, #tpu.memory_space<vmem>>, vector<8x32xf32>
    %cst = arith.constant dense<0.000000e+00> : vector<40x32xf32>
    %9 = tpu.matmul %0, %8, %cst {dimension_numbers = #tpu.dot_dimension_numbers<[1], [0], [0], [1], [0, 0, 1, 1], [], []>} : vector<40x8xf32>, vector<8x32xf32>, vector<40x32xf32> -> vector<40x32xf32>
    %10 = vector.extract_strided_slice %9 {offsets = [0, 0], sizes = [8, 32], strides = [1, 1]} : vector<40x32xf32> to vector<8x32xf32>
    %11 = vector.extract_strided_slice %9 {offsets = [24, 0], sizes = [8, 32], strides = [1, 1]} : vector<40x32xf32> to vector<8x32xf32>
    %12 = arith.addf %10, %11 : vector<8x32xf32>
    %13 = arith.addf %12, %3 : vector<8x32xf32>
    %14 = arith.negf %13 : vector<8x32xf32>
    %15 = math.exp %14 : vector<8x32xf32>
    %cst_12 = arith.constant 1.000000e+00 : f32
    %16 = vector.broadcast %cst_12 : f32 to vector<8x32xf32>
    %17 = arith.addf %16, %15 : vector<8x32xf32>
    %18 = arith.divf %16, %17 : vector<8x32xf32>
    %19 = vector.extract_strided_slice %9 {offsets = [8, 0], sizes = [8, 32], strides = [1, 1]} : vector<40x32xf32> to vector<8x32xf32>
    %20 = vector.extract_strided_slice %9 {offsets = [32, 0], sizes = [8, 32], strides = [1, 1]} : vector<40x32xf32> to vector<8x32xf32>
    %21 = arith.addf %19, %20 : vector<8x32xf32>
    %22 = arith.addf %21, %5 : vector<8x32xf32>
    %23 = arith.negf %22 : vector<8x32xf32>
    %24 = math.exp %23 : vector<8x32xf32>
    %cst_13 = arith.constant 1.000000e+00 : f32
    %25 = vector.broadcast %cst_13 : f32 to vector<8x32xf32>
    %26 = arith.addf %25, %24 : vector<8x32xf32>
    %27 = arith.divf %25, %26 : vector<8x32xf32>
    %28 = vector.extract_strided_slice %9 {offsets = [16, 0], sizes = [8, 32], strides = [1, 1]} : vector<40x32xf32> to vector<8x32xf32>
    %29 = arith.mulf %27, %8 : vector<8x32xf32>
    %cst_14 = arith.constant dense<0.000000e+00> : vector<8x32xf32>
    %30 = tpu.matmul %1, %29, %cst_14 {dimension_numbers = #tpu.dot_dimension_numbers<[1], [0], [0], [1], [0, 0, 1, 1], [], []>} : vector<8x8xf32>, vector<8x32xf32>, vector<8x32xf32> -> vector<8x32xf32>
    %31 = arith.addf %28, %30 : vector<8x32xf32>
    %32 = arith.addf %31, %7 : vector<8x32xf32>
    %33 = math.tanh %32 : vector<8x32xf32>
    %cst_15 = arith.constant 1.000000e+00 : f32
    %34 = vector.broadcast %cst_15 : f32 to vector<8x32xf32>
    %35 = arith.subf %34, %18 : vector<8x32xf32>
    %36 = arith.mulf %35, %8 : vector<8x32xf32>
    %37 = arith.mulf %18, %33 : vector<8x32xf32>
    %38 = arith.addf %36, %37 : vector<8x32xf32>
    %c0_16 = arith.constant 0 : index
    %c0_17 = arith.constant 0 : index
    %c0_18 = arith.constant 0 : index
    %39 = vector.load %arg5[%c0_16, %c0_17, %c0_18] : memref<3x16x16xf32, #tpu.memory_space<vmem>>, vector<1x16x16xf32>
    %40 = vector.shape_cast %39 : vector<1x16x16xf32> to vector<16x16xf32>
    %c0_19 = arith.constant 0 : index
    %c0_20 = arith.constant 0 : index
    %c0_21 = arith.constant 0 : index
    %41 = vector.load %arg6[%c0_19, %c0_20, %c0_21] : memref<3x16x8xf32, #tpu.memory_space<vmem>>, vector<1x16x8xf32>
    %42 = vector.shape_cast %41 : vector<1x16x8xf32> to vector<16x8xf32>
    %cst_22 = arith.constant dense<0.000000e+00> : vector<16x8xf32>
    %43 = tpu.matmul %40, %42, %cst_22 {dimension_numbers = #tpu.dot_dimension_numbers<[1], [0], [0], [1], [0, 0, 1, 1], [], []>} : vector<16x16xf32>, vector<16x8xf32>, vector<16x8xf32> -> vector<16x8xf32>
    %cst_23 = arith.constant dense<0.000000e+00> : vector<16x32xf32>
    %44 = tpu.matmul %43, %38, %cst_23 {dimension_numbers = #tpu.dot_dimension_numbers<[1], [0], [0], [1], [0, 0, 1, 1], [], []>} : vector<16x8xf32>, vector<8x32xf32>, vector<16x32xf32> -> vector<16x32xf32>
    %cst_24 = arith.constant 0.000000e+00 : f32
    %45 = vector.broadcast %cst_24 : f32 to vector<16x32xf32>
    %46 = arith.cmpf oge, %44, %45 : vector<16x32xf32>
    %cst_25 = arith.constant 0.000000e+00 : f32
    %47 = vector.broadcast %cst_25 : f32 to vector<16x32xf32>
    %48 = arith.mulf %47, %44 : vector<16x32xf32>
    %49 = arith.select %46, %44, %48 : vector<16x32xi1>, vector<16x32xf32>
    %c0_26 = arith.constant 0 : index
    %c0_27 = arith.constant 0 : index
    %c0_28 = arith.constant 0 : index
    %50 = vector.load %arg7[%c0_26, %c0_27, %c0_28] : memref<3x16x32xf32, #tpu.memory_space<vmem>>, vector<1x16x32xf32>
    %51 = vector.shape_cast %50 : vector<1x16x32xf32> to vector<16x32xf32>
    %52 = vector.shape_cast %49 : vector<16x32xf32> to vector<1x16x32xf32>
    tpu.vector_store %arg7[%c0_26, %c0_27, %c0_28], %52 {strides = array<i32>} : memref<3x16x32xf32, #tpu.memory_space<vmem>>, vector<1x16x32xf32>,
    %cst_29 = arith.constant dense<0.000000e+00> : vector<40x32xf32>
    %53 = tpu.matmul %0, %38, %cst_29 {dimension_numbers = #tpu.dot_dimension_numbers<[1], [0], [0], [1], [0, 0, 1, 1], [], []>} : vector<40x8xf32>, vector<8x32xf32>, vector<40x32xf32> -> vector<40x32xf32>
    %54 = vector.extract_strided_slice %53 {offsets = [0, 0], sizes = [8, 32], strides = [1, 1]} : vector<40x32xf32> to vector<8x32xf32>
    %55 = vector.extract_strided_slice %53 {offsets = [24, 0], sizes = [8, 32], strides = [1, 1]} : vector<40x32xf32> to vector<8x32xf32>
    %56 = arith.addf %54, %55 : vector<8x32xf32>
    %57 = arith.addf %56, %3 : vector<8x32xf32>
    %58 = arith.negf %57 : vector<8x32xf32>
    %59 = math.exp %58 : vector<8x32xf32>
    %cst_30 = arith.constant 1.000000e+00 : f32
    %60 = vector.broadcast %cst_30 : f32 to vector<8x32xf32>
    %61 = arith.addf %60, %59 : vector<8x32xf32>
    %62 = arith.divf %60, %61 : vector<8x32xf32>
    %63 = vector.extract_strided_slice %53 {offsets = [8, 0], sizes = [8, 32], strides = [1, 1]} : vector<40x32xf32> to vector<8x32xf32>
    %64 = vector.extract_strided_slice %53 {offsets = [32, 0], sizes = [8, 32], strides = [1, 1]} : vector<40x32xf32> to vector<8x32xf32>
    %65 = arith.addf %63, %64 : vector<8x32xf32>
    %66 = arith.addf %65, %5 : vector<8x32xf32>
    %67 = arith.negf %66 : vector<8x32xf32>
    %68 = math.exp %67 : vector<8x32xf32>
    %cst_31 = arith.constant 1.000000e+00 : f32
    %69 = vector.broadcast %cst_31 : f32 to vector<8x32xf32>
    %70 = arith.addf %69, %68 : vector<8x32xf32>
    %71 = arith.divf %69, %70 : vector<8x32xf32>
    %72 = vector.extract_strided_slice %53 {offsets = [16, 0], sizes = [8, 32], strides = [1, 1]} : vector<40x32xf32> to vector<8x32xf32>
    %73 = arith.mulf %71, %38 : vector<8x32xf32>
    %cst_32 = arith.constant dense<0.000000e+00> : vector<8x32xf32>
    %74 = tpu.matmul %1, %73, %cst_32 {dimension_numbers = #tpu.dot_dimension_numbers<[1], [0], [0], [1], [0, 0, 1, 1], [], []>} : vector<8x8xf32>, vector<8x32xf32>, vector<8x32xf32> -> vector<8x32xf32>
    %75 = arith.addf %72, %74 : vector<8x32xf32>
    %76 = arith.addf %75, %7 : vector<8x32xf32>
    %77 = math.tanh %76 : vector<8x32xf32>
    %cst_33 = arith.constant 1.000000e+00 : f32
    %78 = vector.broadcast %cst_33 : f32 to vector<8x32xf32>
    %79 = arith.subf %78, %62 : vector<8x32xf32>
    %80 = arith.mulf %79, %38 : vector<8x32xf32>
    %81 = arith.mulf %62, %77 : vector<8x32xf32>
    %82 = arith.addf %80, %81 : vector<8x32xf32>
    %c1_34 = arith.constant 1 : index
    %c0_35 = arith.constant 0 : index
    %c0_36 = arith.constant 0 : index
    %83 = vector.load %arg5[%c1_34, %c0_35, %c0_36] : memref<3x16x16xf32, #tpu.memory_space<vmem>>, vector<1x16x16xf32>
    %84 = vector.shape_cast %83 : vector<1x16x16xf32> to vector<16x16xf32>
    %c1_37 = arith.constant 1 : index
    %c0_38 = arith.constant 0 : index
    %c0_39 = arith.constant 0 : index
    %85 = vector.load %arg6[%c1_37, %c0_38, %c0_39] : memref<3x16x8xf32, #tpu.memory_space<vmem>>, vector<1x16x8xf32>
    %86 = vector.shape_cast %85 : vector<1x16x8xf32> to vector<16x8xf32>
    %cst_40 = arith.constant dense<0.000000e+00> : vector<16x8xf32>
    %87 = tpu.matmul %84, %86, %cst_40 {dimension_numbers = #tpu.dot_dimension_numbers<[1], [0], [0], [1], [0, 0, 1, 1], [], []>} : vector<16x16xf32>, vector<16x8xf32>, vector<16x8xf32> -> vector<16x8xf32>
    %cst_41 = arith.constant dense<0.000000e+00> : vector<16x32xf32>
    %88 = tpu.matmul %87, %82, %cst_41 {dimension_numbers = #tpu.dot_dimension_numbers<[1], [0], [0], [1], [0, 0, 1, 1], [], []>} : vector<16x8xf32>, vector<8x32xf32>, vector<16x32xf32> -> vector<16x32xf32>
    %cst_42 = arith.constant 0.000000e+00 : f32
    %89 = vector.broadcast %cst_42 : f32 to vector<16x32xf32>
    %90 = arith.cmpf oge, %88, %89 : vector<16x32xf32>
    %cst_43 = arith.constant 0.000000e+00 : f32
    %91 = vector.broadcast %cst_43 : f32 to vector<16x32xf32>
    %92 = arith.mulf %91, %88 : vector<16x32xf32>
    %93 = arith.select %90, %88, %92 : vector<16x32xi1>, vector<16x32xf32>
    %c1_44 = arith.constant 1 : index
    %c0_45 = arith.constant 0 : index
    %c0_46 = arith.constant 0 : index
    %94 = vector.load %arg7[%c1_44, %c0_45, %c0_46] : memref<3x16x32xf32, #tpu.memory_space<vmem>>, vector<1x16x32xf32>
    %95 = vector.shape_cast %94 : vector<1x16x32xf32> to vector<16x32xf32>
    %96 = vector.shape_cast %93 : vector<16x32xf32> to vector<1x16x32xf32>
    tpu.vector_store %arg7[%c1_44, %c0_45, %c0_46], %96 {strides = array<i32>} : memref<3x16x32xf32, #tpu.memory_space<vmem>>, vector<1x16x32xf32>,
    %cst_47 = arith.constant dense<0.000000e+00> : vector<40x32xf32>
    %97 = tpu.matmul %0, %82, %cst_47 {dimension_numbers = #tpu.dot_dimension_numbers<[1], [0], [0], [1], [0, 0, 1, 1], [], []>} : vector<40x8xf32>, vector<8x32xf32>, vector<40x32xf32> -> vector<40x32xf32>
    %98 = vector.extract_strided_slice %97 {offsets = [0, 0], sizes = [8, 32], strides = [1, 1]} : vector<40x32xf32> to vector<8x32xf32>
    %99 = vector.extract_strided_slice %97 {offsets = [24, 0], sizes = [8, 32], strides = [1, 1]} : vector<40x32xf32> to vector<8x32xf32>
    %100 = arith.addf %98, %99 : vector<8x32xf32>
    %101 = arith.addf %100, %3 : vector<8x32xf32>
    %102 = arith.negf %101 : vector<8x32xf32>
    %103 = math.exp %102 : vector<8x32xf32>
    %cst_48 = arith.constant 1.000000e+00 : f32
    %104 = vector.broadcast %cst_48 : f32 to vector<8x32xf32>
    %105 = arith.addf %104, %103 : vector<8x32xf32>
    %106 = arith.divf %104, %105 : vector<8x32xf32>
    %107 = vector.extract_strided_slice %97 {offsets = [8, 0], sizes = [8, 32], strides = [1, 1]} : vector<40x32xf32> to vector<8x32xf32>
    %108 = vector.extract_strided_slice %97 {offsets = [32, 0], sizes = [8, 32], strides = [1, 1]} : vector<40x32xf32> to vector<8x32xf32>
    %109 = arith.addf %107, %108 : vector<8x32xf32>
    %110 = arith.addf %109, %5 : vector<8x32xf32>
    %111 = arith.negf %110 : vector<8x32xf32>
    %112 = math.exp %111 : vector<8x32xf32>
    %cst_49 = arith.constant 1.000000e+00 : f32
    %113 = vector.broadcast %cst_49 : f32 to vector<8x32xf32>
    %114 = arith.addf %113, %112 : vector<8x32xf32>
    %115 = arith.divf %113, %114 : vector<8x32xf32>
    %116 = vector.extract_strided_slice %97 {offsets = [16, 0], sizes = [8, 32], strides = [1, 1]} : vector<40x32xf32> to vector<8x32xf32>
    %117 = arith.mulf %115, %82 : vector<8x32xf32>
    %cst_50 = arith.constant dense<0.000000e+00> : vector<8x32xf32>
    %118 = tpu.matmul %1, %117, %cst_50 {dimension_numbers = #tpu.dot_dimension_numbers<[1], [0], [0], [1], [0, 0, 1, 1], [], []>} : vector<8x8xf32>, vector<8x32xf32>, vector<8x32xf32> -> vector<8x32xf32>
    %119 = arith.addf %116, %118 : vector<8x32xf32>
    %120 = arith.addf %119, %7 : vector<8x32xf32>
    %121 = math.tanh %120 : vector<8x32xf32>
    %cst_51 = arith.constant 1.000000e+00 : f32
    %122 = vector.broadcast %cst_51 : f32 to vector<8x32xf32>
    %123 = arith.subf %122, %106 : vector<8x32xf32>
    %124 = arith.mulf %123, %82 : vector<8x32xf32>
    %125 = arith.mulf %106, %121 : vector<8x32xf32>
    %126 = arith.addf %124, %125 : vector<8x32xf32>
    %c2_52 = arith.constant 2 : index
    %c0_53 = arith.constant 0 : index
    %c0_54 = arith.constant 0 : index
    %127 = vector.load %arg5[%c2_52, %c0_53, %c0_54] : memref<3x16x16xf32, #tpu.memory_space<vmem>>, vector<1x16x16xf32>
    %128 = vector.shape_cast %127 : vector<1x16x16xf32> to vector<16x16xf32>
    %c2_55 = arith.constant 2 : index
    %c0_56 = arith.constant 0 : index
    %c0_57 = arith.constant 0 : index
    %129 = vector.load %arg6[%c2_55, %c0_56, %c0_57] : memref<3x16x8xf32, #tpu.memory_space<vmem>>, vector<1x16x8xf32>
    %130 = vector.shape_cast %129 : vector<1x16x8xf32> to vector<16x8xf32>
    %cst_58 = arith.constant dense<0.000000e+00> : vector<16x8xf32>
    %131 = tpu.matmul %128, %130, %cst_58 {dimension_numbers = #tpu.dot_dimension_numbers<[1], [0], [0], [1], [0, 0, 1, 1], [], []>} : vector<16x16xf32>, vector<16x8xf32>, vector<16x8xf32> -> vector<16x8xf32>
    %cst_59 = arith.constant dense<0.000000e+00> : vector<16x32xf32>
    %132 = tpu.matmul %131, %126, %cst_59 {dimension_numbers = #tpu.dot_dimension_numbers<[1], [0], [0], [1], [0, 0, 1, 1], [], []>} : vector<16x8xf32>, vector<8x32xf32>, vector<16x32xf32> -> vector<16x32xf32>
    %cst_60 = arith.constant 0.000000e+00 : f32
    %133 = vector.broadcast %cst_60 : f32 to vector<16x32xf32>
    %134 = arith.cmpf oge, %132, %133 : vector<16x32xf32>
    %cst_61 = arith.constant 0.000000e+00 : f32
    %135 = vector.broadcast %cst_61 : f32 to vector<16x32xf32>
    %136 = arith.mulf %135, %132 : vector<16x32xf32>
    %137 = arith.select %134, %132, %136 : vector<16x32xi1>, vector<16x32xf32>
    %c2_62 = arith.constant 2 : index
    %c0_63 = arith.constant 0 : index
    %c0_64 = arith.constant 0 : index
    %138 = vector.load %arg7[%c2_62, %c0_63, %c0_64] : memref<3x16x32xf32, #tpu.memory_space<vmem>>, vector<1x16x32xf32>
    %139 = vector.shape_cast %138 : vector<1x16x32xf32> to vector<16x32xf32>
    %140 = vector.shape_cast %137 : vector<16x32xf32> to vector<1x16x32xf32>
    tpu.vector_store %arg7[%c2_62, %c0_63, %c0_64], %140 {strides = array<i32>} : memref<3x16x32xf32, #tpu.memory_space<vmem>>, vector<1x16x32xf32>,
    return
  }
  func.func @transform_0(%arg0: i32) -> (i32, i32) {
    %c0_i32 = arith.constant 0 : i32
    %c0_i32_0 = arith.constant 0 : i32
    %c0_i32_1 = arith.constant 0 : i32
    return %c0_i32, %c0_i32_0 : i32, i32
  }
  func.func @transform_1(%arg0: i32) -> (i32, i32) {
    %c0_i32 = arith.constant 0 : i32
    %c0_i32_0 = arith.constant 0 : i32
    %c0_i32_1 = arith.constant 0 : i32
    return %c0_i32, %c0_i32_0 : i32, i32
  }
  func.func @transform_2(%arg0: i32) -> (i32, i32, i32) {
    %c0_i32 = arith.constant 0 : i32
    %c0_i32_0 = arith.constant 0 : i32
    %c0_i32_1 = arith.constant 0 : i32
    %c0_i32_2 = arith.constant 0 : i32
    return %c0_i32, %c0_i32_0, %c0_i32_1 : i32, i32, i32
  }
  func.func @transform_3(%arg0: i32) -> (i32, i32) {
    %c0_i32 = arith.constant 0 : i32
    %c0_i32_0 = arith.constant 0 : i32
    %c0_i32_1 = arith.constant 0 : i32
    return %c0_i32, %c0_i32_0 : i32, i32
  }
  func.func @transform_4(%arg0: i32) -> (i32, i32, i32) {
    %c0_i32 = arith.constant 0 : i32
    %c0_i32_0 = arith.constant 0 : i32
    %c0_i32_1 = arith.constant 0 : i32
    %c0_i32_2 = arith.constant 0 : i32
    return %c0_i32, %c0_i32_0, %c0_i32_1 : i32, i32, i32
  }
  func.func @transform_5(%arg0: i32) -> (i32, i32, i32) {
    %c0_i32 = arith.constant 0 : i32
    %c0_i32_0 = arith.constant 0 : i32
    %c0_i32_1 = arith.constant 0 : i32
    %c0_i32_2 = arith.constant 0 : i32
    return %c0_i32, %c0_i32_0, %c0_i32_1 : i32, i32, i32
  }
  func.func @transform_6(%arg0: i32) -> (i32, i32, i32) {
    %c0_i32 = arith.constant 0 : i32
    %c0_i32_0 = arith.constant 0 : i32
    %c0_i32_1 = arith.constant 0 : i32
    %c0_i32_2 = arith.constant 0 : i32
    return %c0_i32, %c0_i32_0, %c0_i32_1 : i32, i32, i32
  }
}

module attributes {stable_mosaic.version = 11 : i64} {
  func.func @_egcn_layer_kernel(%arg0: i32, %arg1: memref<160x32xf32, #tpu.memory_space<vmem>>, %arg2: memref<32x32xf32, #tpu.memory_space<vmem>>, %arg3: memref<3x32x16xf32, #tpu.memory_space<vmem>>, %arg4: memref<32x16xf32, #tpu.memory_space<vmem>>, %arg5: memref<3x16x16xf32, #tpu.memory_space<vmem>>, %arg6: memref<3x16x32xf32, #tpu.memory_space<vmem>>, %arg7: memref<3x16x16xf32, #tpu.memory_space<vmem>>) attributes {dimension_semantics = [#tpu.dimension_semantics<arbitrary>], iteration_bounds = array<i64: 1>, scalar_prefetch = 0 : i64, scratch_operands = 0 : i64, tpu.core_type = #tpu.core_type<tc>, window_params = [{pipeline_mode = #tpu.pipeline_mode<synchronous>, transform_indices = @transform_0, window_bounds = array<i64: 160, 32>}, {pipeline_mode = #tpu.pipeline_mode<synchronous>, transform_indices = @transform_1, window_bounds = array<i64: 32, 32>}, {pipeline_mode = #tpu.pipeline_mode<synchronous>, transform_indices = @transform_2, window_bounds = array<i64: 3, 32, 16>}, {pipeline_mode = #tpu.pipeline_mode<synchronous>, transform_indices = @transform_3, window_bounds = array<i64: 32, 16>}, {pipeline_mode = #tpu.pipeline_mode<synchronous>, transform_indices = @transform_4, window_bounds = array<i64: 3, 16, 16>}, {pipeline_mode = #tpu.pipeline_mode<synchronous>, transform_indices = @transform_5, window_bounds = array<i64: 3, 16, 32>}, {pipeline_mode = #tpu.pipeline_mode<synchronous>, transform_indices = @transform_6, window_bounds = array<i64: 3, 16, 16>}]} {
    %c0 = arith.constant 0 : index
    %c0_0 = arith.constant 0 : index
    %0 = vector.load %arg1[%c0, %c0_0] : memref<160x32xf32, #tpu.memory_space<vmem>>, vector<160x32xf32>
    %c0_1 = arith.constant 0 : index
    %c0_2 = arith.constant 0 : index
    %1 = vector.load %arg2[%c0_1, %c0_2] : memref<32x32xf32, #tpu.memory_space<vmem>>, vector<32x32xf32>
    %c0_3 = arith.constant 0 : index
    %c0_4 = arith.constant 0 : index
    %c0_5 = arith.constant 0 : index
    %2 = vector.load %arg3[%c0_3, %c0_4, %c0_5] : memref<3x32x16xf32, #tpu.memory_space<vmem>>, vector<1x32x16xf32>
    %3 = vector.shape_cast %2 : vector<1x32x16xf32> to vector<32x16xf32>
    %c1 = arith.constant 1 : index
    %c0_6 = arith.constant 0 : index
    %c0_7 = arith.constant 0 : index
    %4 = vector.load %arg3[%c1, %c0_6, %c0_7] : memref<3x32x16xf32, #tpu.memory_space<vmem>>, vector<1x32x16xf32>
    %5 = vector.shape_cast %4 : vector<1x32x16xf32> to vector<32x16xf32>
    %c2 = arith.constant 2 : index
    %c0_8 = arith.constant 0 : index
    %c0_9 = arith.constant 0 : index
    %6 = vector.load %arg3[%c2, %c0_8, %c0_9] : memref<3x32x16xf32, #tpu.memory_space<vmem>>, vector<1x32x16xf32>
    %7 = vector.shape_cast %6 : vector<1x32x16xf32> to vector<32x16xf32>
    %c0_10 = arith.constant 0 : index
    %c0_11 = arith.constant 0 : index
    %8 = vector.load %arg4[%c0_10, %c0_11] : memref<32x16xf32, #tpu.memory_space<vmem>>, vector<32x16xf32>
    %cst = arith.constant dense<0.000000e+00> : vector<160x16xf32>
    %9 = tpu.matmul %0, %8, %cst {dimension_numbers = #tpu.dot_dimension_numbers<[1], [0], [0], [1], [0, 0, 1, 1], [], []>} : vector<160x32xf32>, vector<32x16xf32>, vector<160x16xf32> -> vector<160x16xf32>
    %10 = vector.extract_strided_slice %9 {offsets = [0, 0], sizes = [32, 16], strides = [1, 1]} : vector<160x16xf32> to vector<32x16xf32>
    %11 = vector.extract_strided_slice %9 {offsets = [96, 0], sizes = [32, 16], strides = [1, 1]} : vector<160x16xf32> to vector<32x16xf32>
    %12 = arith.addf %10, %11 : vector<32x16xf32>
    %13 = arith.addf %12, %3 : vector<32x16xf32>
    %14 = arith.negf %13 : vector<32x16xf32>
    %15 = math.exp %14 : vector<32x16xf32>
    %cst_12 = arith.constant 1.000000e+00 : f32
    %16 = vector.broadcast %cst_12 : f32 to vector<32x16xf32>
    %17 = arith.addf %16, %15 : vector<32x16xf32>
    %18 = arith.divf %16, %17 : vector<32x16xf32>
    %19 = vector.extract_strided_slice %9 {offsets = [32, 0], sizes = [32, 16], strides = [1, 1]} : vector<160x16xf32> to vector<32x16xf32>
    %20 = vector.extract_strided_slice %9 {offsets = [128, 0], sizes = [32, 16], strides = [1, 1]} : vector<160x16xf32> to vector<32x16xf32>
    %21 = arith.addf %19, %20 : vector<32x16xf32>
    %22 = arith.addf %21, %5 : vector<32x16xf32>
    %23 = arith.negf %22 : vector<32x16xf32>
    %24 = math.exp %23 : vector<32x16xf32>
    %cst_13 = arith.constant 1.000000e+00 : f32
    %25 = vector.broadcast %cst_13 : f32 to vector<32x16xf32>
    %26 = arith.addf %25, %24 : vector<32x16xf32>
    %27 = arith.divf %25, %26 : vector<32x16xf32>
    %28 = vector.extract_strided_slice %9 {offsets = [64, 0], sizes = [32, 16], strides = [1, 1]} : vector<160x16xf32> to vector<32x16xf32>
    %29 = arith.mulf %27, %8 : vector<32x16xf32>
    %cst_14 = arith.constant dense<0.000000e+00> : vector<32x16xf32>
    %30 = tpu.matmul %1, %29, %cst_14 {dimension_numbers = #tpu.dot_dimension_numbers<[1], [0], [0], [1], [0, 0, 1, 1], [], []>} : vector<32x32xf32>, vector<32x16xf32>, vector<32x16xf32> -> vector<32x16xf32>
    %31 = arith.addf %28, %30 : vector<32x16xf32>
    %32 = arith.addf %31, %7 : vector<32x16xf32>
    %33 = math.tanh %32 : vector<32x16xf32>
    %cst_15 = arith.constant 1.000000e+00 : f32
    %34 = vector.broadcast %cst_15 : f32 to vector<32x16xf32>
    %35 = arith.subf %34, %18 : vector<32x16xf32>
    %36 = arith.mulf %35, %8 : vector<32x16xf32>
    %37 = arith.mulf %18, %33 : vector<32x16xf32>
    %38 = arith.addf %36, %37 : vector<32x16xf32>
    %c0_16 = arith.constant 0 : index
    %c0_17 = arith.constant 0 : index
    %c0_18 = arith.constant 0 : index
    %39 = vector.load %arg5[%c0_16, %c0_17, %c0_18] : memref<3x16x16xf32, #tpu.memory_space<vmem>>, vector<1x16x16xf32>
    %40 = vector.shape_cast %39 : vector<1x16x16xf32> to vector<16x16xf32>
    %c0_19 = arith.constant 0 : index
    %c0_20 = arith.constant 0 : index
    %c0_21 = arith.constant 0 : index
    %41 = vector.load %arg6[%c0_19, %c0_20, %c0_21] : memref<3x16x32xf32, #tpu.memory_space<vmem>>, vector<1x16x32xf32>
    %42 = vector.shape_cast %41 : vector<1x16x32xf32> to vector<16x32xf32>
    %cst_22 = arith.constant dense<0.000000e+00> : vector<16x16xf32>
    %43 = tpu.matmul %42, %38, %cst_22 {dimension_numbers = #tpu.dot_dimension_numbers<[1], [0], [0], [1], [0, 0, 1, 1], [], []>} : vector<16x32xf32>, vector<32x16xf32>, vector<16x16xf32> -> vector<16x16xf32>
    %cst_23 = arith.constant dense<0.000000e+00> : vector<16x16xf32>
    %44 = tpu.matmul %40, %43, %cst_23 {dimension_numbers = #tpu.dot_dimension_numbers<[1], [0], [0], [1], [0, 0, 1, 1], [], []>} : vector<16x16xf32>, vector<16x16xf32>, vector<16x16xf32> -> vector<16x16xf32>
    %cst_24 = arith.constant 0.000000e+00 : f32
    %45 = vector.broadcast %cst_24 : f32 to vector<16x16xf32>
    %46 = arith.cmpf oge, %44, %45 : vector<16x16xf32>
    %cst_25 = arith.constant 0.000000e+00 : f32
    %47 = vector.broadcast %cst_25 : f32 to vector<16x16xf32>
    %48 = arith.mulf %47, %44 : vector<16x16xf32>
    %49 = arith.select %46, %44, %48 : vector<16x16xi1>, vector<16x16xf32>
    %c0_26 = arith.constant 0 : index
    %c0_27 = arith.constant 0 : index
    %c0_28 = arith.constant 0 : index
    %50 = vector.load %arg7[%c0_26, %c0_27, %c0_28] : memref<3x16x16xf32, #tpu.memory_space<vmem>>, vector<1x16x16xf32>
    %51 = vector.shape_cast %50 : vector<1x16x16xf32> to vector<16x16xf32>
    %52 = vector.shape_cast %49 : vector<16x16xf32> to vector<1x16x16xf32>
    tpu.vector_store %arg7[%c0_26, %c0_27, %c0_28], %52 {strides = array<i32>} : memref<3x16x16xf32, #tpu.memory_space<vmem>>, vector<1x16x16xf32>,
    %cst_29 = arith.constant dense<0.000000e+00> : vector<160x16xf32>
    %53 = tpu.matmul %0, %38, %cst_29 {dimension_numbers = #tpu.dot_dimension_numbers<[1], [0], [0], [1], [0, 0, 1, 1], [], []>} : vector<160x32xf32>, vector<32x16xf32>, vector<160x16xf32> -> vector<160x16xf32>
    %54 = vector.extract_strided_slice %53 {offsets = [0, 0], sizes = [32, 16], strides = [1, 1]} : vector<160x16xf32> to vector<32x16xf32>
    %55 = vector.extract_strided_slice %53 {offsets = [96, 0], sizes = [32, 16], strides = [1, 1]} : vector<160x16xf32> to vector<32x16xf32>
    %56 = arith.addf %54, %55 : vector<32x16xf32>
    %57 = arith.addf %56, %3 : vector<32x16xf32>
    %58 = arith.negf %57 : vector<32x16xf32>
    %59 = math.exp %58 : vector<32x16xf32>
    %cst_30 = arith.constant 1.000000e+00 : f32
    %60 = vector.broadcast %cst_30 : f32 to vector<32x16xf32>
    %61 = arith.addf %60, %59 : vector<32x16xf32>
    %62 = arith.divf %60, %61 : vector<32x16xf32>
    %63 = vector.extract_strided_slice %53 {offsets = [32, 0], sizes = [32, 16], strides = [1, 1]} : vector<160x16xf32> to vector<32x16xf32>
    %64 = vector.extract_strided_slice %53 {offsets = [128, 0], sizes = [32, 16], strides = [1, 1]} : vector<160x16xf32> to vector<32x16xf32>
    %65 = arith.addf %63, %64 : vector<32x16xf32>
    %66 = arith.addf %65, %5 : vector<32x16xf32>
    %67 = arith.negf %66 : vector<32x16xf32>
    %68 = math.exp %67 : vector<32x16xf32>
    %cst_31 = arith.constant 1.000000e+00 : f32
    %69 = vector.broadcast %cst_31 : f32 to vector<32x16xf32>
    %70 = arith.addf %69, %68 : vector<32x16xf32>
    %71 = arith.divf %69, %70 : vector<32x16xf32>
    %72 = vector.extract_strided_slice %53 {offsets = [64, 0], sizes = [32, 16], strides = [1, 1]} : vector<160x16xf32> to vector<32x16xf32>
    %73 = arith.mulf %71, %38 : vector<32x16xf32>
    %cst_32 = arith.constant dense<0.000000e+00> : vector<32x16xf32>
    %74 = tpu.matmul %1, %73, %cst_32 {dimension_numbers = #tpu.dot_dimension_numbers<[1], [0], [0], [1], [0, 0, 1, 1], [], []>} : vector<32x32xf32>, vector<32x16xf32>, vector<32x16xf32> -> vector<32x16xf32>
    %75 = arith.addf %72, %74 : vector<32x16xf32>
    %76 = arith.addf %75, %7 : vector<32x16xf32>
    %77 = math.tanh %76 : vector<32x16xf32>
    %cst_33 = arith.constant 1.000000e+00 : f32
    %78 = vector.broadcast %cst_33 : f32 to vector<32x16xf32>
    %79 = arith.subf %78, %62 : vector<32x16xf32>
    %80 = arith.mulf %79, %38 : vector<32x16xf32>
    %81 = arith.mulf %62, %77 : vector<32x16xf32>
    %82 = arith.addf %80, %81 : vector<32x16xf32>
    %c1_34 = arith.constant 1 : index
    %c0_35 = arith.constant 0 : index
    %c0_36 = arith.constant 0 : index
    %83 = vector.load %arg5[%c1_34, %c0_35, %c0_36] : memref<3x16x16xf32, #tpu.memory_space<vmem>>, vector<1x16x16xf32>
    %84 = vector.shape_cast %83 : vector<1x16x16xf32> to vector<16x16xf32>
    %c1_37 = arith.constant 1 : index
    %c0_38 = arith.constant 0 : index
    %c0_39 = arith.constant 0 : index
    %85 = vector.load %arg6[%c1_37, %c0_38, %c0_39] : memref<3x16x32xf32, #tpu.memory_space<vmem>>, vector<1x16x32xf32>
    %86 = vector.shape_cast %85 : vector<1x16x32xf32> to vector<16x32xf32>
    %cst_40 = arith.constant dense<0.000000e+00> : vector<16x16xf32>
    %87 = tpu.matmul %86, %82, %cst_40 {dimension_numbers = #tpu.dot_dimension_numbers<[1], [0], [0], [1], [0, 0, 1, 1], [], []>} : vector<16x32xf32>, vector<32x16xf32>, vector<16x16xf32> -> vector<16x16xf32>
    %cst_41 = arith.constant dense<0.000000e+00> : vector<16x16xf32>
    %88 = tpu.matmul %84, %87, %cst_41 {dimension_numbers = #tpu.dot_dimension_numbers<[1], [0], [0], [1], [0, 0, 1, 1], [], []>} : vector<16x16xf32>, vector<16x16xf32>, vector<16x16xf32> -> vector<16x16xf32>
    %cst_42 = arith.constant 0.000000e+00 : f32
    %89 = vector.broadcast %cst_42 : f32 to vector<16x16xf32>
    %90 = arith.cmpf oge, %88, %89 : vector<16x16xf32>
    %cst_43 = arith.constant 0.000000e+00 : f32
    %91 = vector.broadcast %cst_43 : f32 to vector<16x16xf32>
    %92 = arith.mulf %91, %88 : vector<16x16xf32>
    %93 = arith.select %90, %88, %92 : vector<16x16xi1>, vector<16x16xf32>
    %c1_44 = arith.constant 1 : index
    %c0_45 = arith.constant 0 : index
    %c0_46 = arith.constant 0 : index
    %94 = vector.load %arg7[%c1_44, %c0_45, %c0_46] : memref<3x16x16xf32, #tpu.memory_space<vmem>>, vector<1x16x16xf32>
    %95 = vector.shape_cast %94 : vector<1x16x16xf32> to vector<16x16xf32>
    %96 = vector.shape_cast %93 : vector<16x16xf32> to vector<1x16x16xf32>
    tpu.vector_store %arg7[%c1_44, %c0_45, %c0_46], %96 {strides = array<i32>} : memref<3x16x16xf32, #tpu.memory_space<vmem>>, vector<1x16x16xf32>,
    %cst_47 = arith.constant dense<0.000000e+00> : vector<160x16xf32>
    %97 = tpu.matmul %0, %82, %cst_47 {dimension_numbers = #tpu.dot_dimension_numbers<[1], [0], [0], [1], [0, 0, 1, 1], [], []>} : vector<160x32xf32>, vector<32x16xf32>, vector<160x16xf32> -> vector<160x16xf32>
    %98 = vector.extract_strided_slice %97 {offsets = [0, 0], sizes = [32, 16], strides = [1, 1]} : vector<160x16xf32> to vector<32x16xf32>
    %99 = vector.extract_strided_slice %97 {offsets = [96, 0], sizes = [32, 16], strides = [1, 1]} : vector<160x16xf32> to vector<32x16xf32>
    %100 = arith.addf %98, %99 : vector<32x16xf32>
    %101 = arith.addf %100, %3 : vector<32x16xf32>
    %102 = arith.negf %101 : vector<32x16xf32>
    %103 = math.exp %102 : vector<32x16xf32>
    %cst_48 = arith.constant 1.000000e+00 : f32
    %104 = vector.broadcast %cst_48 : f32 to vector<32x16xf32>
    %105 = arith.addf %104, %103 : vector<32x16xf32>
    %106 = arith.divf %104, %105 : vector<32x16xf32>
    %107 = vector.extract_strided_slice %97 {offsets = [32, 0], sizes = [32, 16], strides = [1, 1]} : vector<160x16xf32> to vector<32x16xf32>
    %108 = vector.extract_strided_slice %97 {offsets = [128, 0], sizes = [32, 16], strides = [1, 1]} : vector<160x16xf32> to vector<32x16xf32>
    %109 = arith.addf %107, %108 : vector<32x16xf32>
    %110 = arith.addf %109, %5 : vector<32x16xf32>
    %111 = arith.negf %110 : vector<32x16xf32>
    %112 = math.exp %111 : vector<32x16xf32>
    %cst_49 = arith.constant 1.000000e+00 : f32
    %113 = vector.broadcast %cst_49 : f32 to vector<32x16xf32>
    %114 = arith.addf %113, %112 : vector<32x16xf32>
    %115 = arith.divf %113, %114 : vector<32x16xf32>
    %116 = vector.extract_strided_slice %97 {offsets = [64, 0], sizes = [32, 16], strides = [1, 1]} : vector<160x16xf32> to vector<32x16xf32>
    %117 = arith.mulf %115, %82 : vector<32x16xf32>
    %cst_50 = arith.constant dense<0.000000e+00> : vector<32x16xf32>
    %118 = tpu.matmul %1, %117, %cst_50 {dimension_numbers = #tpu.dot_dimension_numbers<[1], [0], [0], [1], [0, 0, 1, 1], [], []>} : vector<32x32xf32>, vector<32x16xf32>, vector<32x16xf32> -> vector<32x16xf32>
    %119 = arith.addf %116, %118 : vector<32x16xf32>
    %120 = arith.addf %119, %7 : vector<32x16xf32>
    %121 = math.tanh %120 : vector<32x16xf32>
    %cst_51 = arith.constant 1.000000e+00 : f32
    %122 = vector.broadcast %cst_51 : f32 to vector<32x16xf32>
    %123 = arith.subf %122, %106 : vector<32x16xf32>
    %124 = arith.mulf %123, %82 : vector<32x16xf32>
    %125 = arith.mulf %106, %121 : vector<32x16xf32>
    %126 = arith.addf %124, %125 : vector<32x16xf32>
    %c2_52 = arith.constant 2 : index
    %c0_53 = arith.constant 0 : index
    %c0_54 = arith.constant 0 : index
    %127 = vector.load %arg5[%c2_52, %c0_53, %c0_54] : memref<3x16x16xf32, #tpu.memory_space<vmem>>, vector<1x16x16xf32>
    %128 = vector.shape_cast %127 : vector<1x16x16xf32> to vector<16x16xf32>
    %c2_55 = arith.constant 2 : index
    %c0_56 = arith.constant 0 : index
    %c0_57 = arith.constant 0 : index
    %129 = vector.load %arg6[%c2_55, %c0_56, %c0_57] : memref<3x16x32xf32, #tpu.memory_space<vmem>>, vector<1x16x32xf32>
    %130 = vector.shape_cast %129 : vector<1x16x32xf32> to vector<16x32xf32>
    %cst_58 = arith.constant dense<0.000000e+00> : vector<16x16xf32>
    %131 = tpu.matmul %130, %126, %cst_58 {dimension_numbers = #tpu.dot_dimension_numbers<[1], [0], [0], [1], [0, 0, 1, 1], [], []>} : vector<16x32xf32>, vector<32x16xf32>, vector<16x16xf32> -> vector<16x16xf32>
    %cst_59 = arith.constant dense<0.000000e+00> : vector<16x16xf32>
    %132 = tpu.matmul %128, %131, %cst_59 {dimension_numbers = #tpu.dot_dimension_numbers<[1], [0], [0], [1], [0, 0, 1, 1], [], []>} : vector<16x16xf32>, vector<16x16xf32>, vector<16x16xf32> -> vector<16x16xf32>
    %cst_60 = arith.constant 0.000000e+00 : f32
    %133 = vector.broadcast %cst_60 : f32 to vector<16x16xf32>
    %134 = arith.cmpf oge, %132, %133 : vector<16x16xf32>
    %cst_61 = arith.constant 0.000000e+00 : f32
    %135 = vector.broadcast %cst_61 : f32 to vector<16x16xf32>
    %136 = arith.mulf %135, %132 : vector<16x16xf32>
    %137 = arith.select %134, %132, %136 : vector<16x16xi1>, vector<16x16xf32>
    %c2_62 = arith.constant 2 : index
    %c0_63 = arith.constant 0 : index
    %c0_64 = arith.constant 0 : index
    %138 = vector.load %arg7[%c2_62, %c0_63, %c0_64] : memref<3x16x16xf32, #tpu.memory_space<vmem>>, vector<1x16x16xf32>
    %139 = vector.shape_cast %138 : vector<1x16x16xf32> to vector<16x16xf32>
    %140 = vector.shape_cast %137 : vector<16x16xf32> to vector<1x16x16xf32>
    tpu.vector_store %arg7[%c2_62, %c0_63, %c0_64], %140 {strides = array<i32>} : memref<3x16x16xf32, #tpu.memory_space<vmem>>, vector<1x16x16xf32>,
    return
  }
  func.func @transform_0(%arg0: i32) -> (i32, i32) {
    %c0_i32 = arith.constant 0 : i32
    %c0_i32_0 = arith.constant 0 : i32
    %c0_i32_1 = arith.constant 0 : i32
    return %c0_i32, %c0_i32_0 : i32, i32
  }
  func.func @transform_1(%arg0: i32) -> (i32, i32) {
    %c0_i32 = arith.constant 0 : i32
    %c0_i32_0 = arith.constant 0 : i32
    %c0_i32_1 = arith.constant 0 : i32
    return %c0_i32, %c0_i32_0 : i32, i32
  }
  func.func @transform_2(%arg0: i32) -> (i32, i32, i32) {
    %c0_i32 = arith.constant 0 : i32
    %c0_i32_0 = arith.constant 0 : i32
    %c0_i32_1 = arith.constant 0 : i32
    %c0_i32_2 = arith.constant 0 : i32
    return %c0_i32, %c0_i32_0, %c0_i32_1 : i32, i32, i32
  }
  func.func @transform_3(%arg0: i32) -> (i32, i32) {
    %c0_i32 = arith.constant 0 : i32
    %c0_i32_0 = arith.constant 0 : i32
    %c0_i32_1 = arith.constant 0 : i32
    return %c0_i32, %c0_i32_0 : i32, i32
  }
  func.func @transform_4(%arg0: i32) -> (i32, i32, i32) {
    %c0_i32 = arith.constant 0 : i32
    %c0_i32_0 = arith.constant 0 : i32
    %c0_i32_1 = arith.constant 0 : i32
    %c0_i32_2 = arith.constant 0 : i32
    return %c0_i32, %c0_i32_0, %c0_i32_1 : i32, i32, i32
  }
  func.func @transform_5(%arg0: i32) -> (i32, i32, i32) {
    %c0_i32 = arith.constant 0 : i32
    %c0_i32_0 = arith.constant 0 : i32
    %c0_i32_1 = arith.constant 0 : i32
    %c0_i32_2 = arith.constant 0 : i32
    return %c0_i32, %c0_i32_0, %c0_i32_1 : i32, i32, i32
  }
  func.func @transform_6(%arg0: i32) -> (i32, i32, i32) {
    %c0_i32 = arith.constant 0 : i32
    %c0_i32_0 = arith.constant 0 : i32
    %c0_i32_1 = arith.constant 0 : i32
    %c0_i32_2 = arith.constant 0 : i32
    return %c0_i32, %c0_i32_0, %c0_i32_1 : i32, i32, i32
  }
}

</mosaic_0001>

<bundles_post_ra>
// kernel: egcn_forward.2
= control target key start
LH: loop header
LB: loop body
LE: loop exit
PB: predicated region body
PF: predicated region fallthrough
CT: control target
= control target key end

     0   :  { %vm35_vm0 = vcmask 64512   ;;  %v1371_v0 = vmov 0.0   ;;  %vm1372_vm1 = vmmov 0   ;;  %vm242_vm2 = vcmask 130048   ;;  %s1636_s3 = inlined_call_operand.vmem [shape: f32[8,32], index: 3, kind: input, shape index: {}]   ;;  %s1637_s0 = inlined_call_operand.vmem [shape: f32[40,8], index: 0, kind: input, shape index: {}]   ;;  %s1638_s2 = inlined_call_operand.vmem [shape: f32[3,8,32], index: 2, kind: input, shape index: {}]   ;;  %s1639_s1 = inlined_call_operand.vmem [shape: f32[8,8], index: 1, kind: input, shape index: {}]   ;;  %s1640_s5 = inlined_call_operand.vmem [shape: f32[3,16,8], index: 5, kind: input, shape index: {}]   ;;  %s1641_s4 = inlined_call_operand.vmem [shape: f32[3,16,16], index: 4, kind: input, shape index: {}]   ;;  %s1642_s6 = inlined_call_operand.vmem [shape: f32[3,16,32], index: 6, kind: output, shape index: {}]  }
   0x1   :  { %1235 = vmatprep.subr.mxu0 %v1371_v0  ;;  %v1412_v1 = vld [vmem:[%s1636_s3] sm:$0xff]  ;;  %1237 = vmatprep.mubr.msk.f32.mxu0 %vm1372_vm1, %v1371_v0  ;;  %v1438_v4 = vld [vmem:[%s1637_s0 + $0x8] sm:$0xff]  ;;  %v1453_v5 = vld [vmem:[%s1637_s0 + $0x10] sm:$0xff]  ;;  %vm411_vm4 = vcmask 261120  }
   0x2   :  { %v1419_v2 = vld [vmem:[%s1637_s0] sm:$0xff]  ;;  %1236 = vmatpush3.msra.mxu0 %v1412_v1  ;;  %1337 = vmatprep.subr.mxu1 %v1371_v0  ;;  %v1462_v6 = vld [vmem:[%s1637_s0 + $0x18] sm:$0xff]  ;;  %v1471_v10 = vld [vmem:[%s1638_s2 + $0x8] sm:$0xff] }
   0x3   :  { %v1426_v3 = vld [vmem:[%s1637_s0 + $0x20] sm:$0xff]  ;;  %1238 = vmatmul.mubr.msk.f32.vlgmr.msra.gmra.mxu0 %vm35_vm0, %v1419_v2  ;;  %1338 = vmatpush3.msra.mxu1 %v1412_v1  ;;  %v241_v27 = vld [vmem:[%s1640_s5 + $0x8] sm:$0xff]  ;;  %v1505_v36 = vld [vmem:[%s1638_s2 + $0x10] sm:$0xff] }
   0x4   :  { %1249 = vmatprep.mubr.msk.f32.mxu1 %vm1372_vm1, %v1371_v0  ;;  %1240 = vmatprep.mubr.msk.f32.mxu0 %vm1372_vm1, %v1371_v0  ;;  %v1478_v26 = vld [vmem:[%s1639_s1] sm:$0xff]  ;;  %v239_v30 = vld [vmem:[%s1641_s4 + $0x8] sm:$0xff] }
   0x5   :  { %1250 = vmatmul.mubr.msk.f32.vlgmr.msra.gmra.mxu1 %vm35_vm0, %v1426_v3  ;;  %1252 = vmatprep.subr.mxu1 %v1371_v0  ;;  %v238_v28 = vld [vmem:[%s1641_s4] sm:$0xff] }
   0x6   :  { %1254 = vmatprep.mubr.msk.f32.mxu1 %vm1372_vm1, %v1371_v0  ;;  %1286 = vmatprep.subr.mxu0 %v1371_v0  ;;  %v240_v29 = vld [vmem:[%s1640_s5] sm:$0xff] }
   0x7   :  { %1241 = vmatmul.mubr.msk.f32.gmra.mxu0 %vm35_vm0, %v1438_v4  ;;  %v1499_v31 = vld [vmem:[%s1638_s2] sm:$0xff] }
   0x8   :  { %1243 = vmatprep.mubr.msk.f32.mxu0 %vm1372_vm1, %v1371_v0 }
   0xb   :  { %1244 = vmatmul.mubr.msk.f32.gmra.mxu0 %vm35_vm0, %v1453_v5 }
   0xc   :  { %1246 = vmatprep.mubr.msk.f32.mxu0 %vm1372_vm1, %v1371_v0 }
   0xf   :  { %1247 = vmatmul.mubr.msk.f32.gmra.mxu0 %vm35_vm0, %v1462_v6 }
  0x10   :  { %1288 = vmatprep.mubr.msk.f32.mxu0 %vm1372_vm1, %v1371_v0 }
  0xc3   :  { %v117_v7 = vpop.f32.mrf.mxu0 }
  0xc5   :  { %v1239_v8 = vpop.f32.mrf.mxu0  ;;  %v137_v9 = vpop.f32.mrf.mxu1 }
  0xc7   :  { %v122_v11 = vpop.f32.mrf.mxu0  ;;  %v1251_v12 = vpop.f32.mrf.mxu1 }
  0xc8   :  { %v149_v13 = vadd.f32 %v137_v9, %v122_v11 }
  0xc9   :  { %v1242_v14 = vpop.f32.mrf.mxu0 }
  0xca   :  { %v150_v15 = vadd.f32 %v1471_v10, %v149_v13 }
  0xcb   :  { %v127_v16 = vpop.f32.mrf.mxu0 }
  0xcc   :  { %v1148_v17 = vmul.f32 -1.442695, %v150_v15 }
  0xcd   :  { %v1245_v18 = vpop.f32.mrf.mxu0 }
  0xce   :  { %1341 = vpow2.f32 %v1148_v17  ;;  %v1162_v17 = vld [vmem:[%s1641_s4 + $0x10] sm:$0xff] }
  0xcf   :  { %v132_v19 = vpop.f32.mrf.mxu0  ;;  %v1164_v18 = vld [vmem:[%s1640_s5 + $0x10] sm:$0xff] }
  0xd0   :  { %v141_v20 = vadd.f32 %v132_v19, %v117_v7  ;;  %v1163_v19 = vld [vmem:[%s1641_s4 + $0x18] sm:$0xff] }
  0xd1   :  { %v1248_v21 = vpop.f32.mrf.mxu0 }
  0xd2   :  { %v142_v32 = vadd.f32 %v141_v20, %v1499_v31 }
  0xd4   :  { %v1147_v33 = vmul.f32 -1.442695, %v142_v32 }
  0xdb   :  { %v1342_v22 = vpop.eup %1341 }
  0xdc   :  { %v154_v23 = vadd.f32 1.0, %v1342_v22 }
  0xde   :  { %1343 = vrcp.f32 %v154_v23 }
  0xdf   :  { %1345 = vpow2.f32 %v1147_v33 }
  0xeb   :  { %v1344_v24 = vpop.eup %1343 }
  0xec   :  { %v157_v25 = vmul.f32 %v1344_v24, %v1412_v1  ;;  %v1346_v34 = vpop.eup %1345 }
  0xed   :  { %v146_v35 = vadd.f32 1.0, %v1346_v34 }
  0xee   :  { %1253 = vmatpush3.msra.mxu1 %v157_v25 }
  0xef   :  { %1255 = vmatmul.mubr.msk.f32.vlgmr.msra.gmra.mxu1 %vm35_vm0, %v1478_v26  ;;  %1257 = vmatprep.subr.mxu1 %v241_v27  ;;  %1347 = vrcp.f32 %v146_v35 }
  0xf0   :  { %1258 = vmatpush3.msra.mxu1 %v241_v27  ;;  %1261 = vmatprep.mubr.msk.f32.mxu1 %vm242_vm2, %v238_v28 }
  0xf1   :  { %1259 = vmatprep.subr.mxu1 %v240_v29 }
  0xf2   :  { %1260 = vmatpush3.msra.mxu1 %v240_v29 }
  0xf3   :  { %1262 = vmatmul.mubr.msk.f32.vlgmr.msra.gmra.mxu1 %vm242_vm2, %v239_v30 }
  0xfc   :  { %v1348_v43 = vpop.eup %1347 }
  0xfd   :  { %v234_v44 = vsub.f32 1.0, %v1348_v43 }
  0xff   :  { %v235_v46 = vmul.f32 %v234_v44, %v1412_v1 }
 0x1af   :  { %v227_v37 = vpop.f32.mrf.mxu1 }
 0x1b0   :  { %v231_v38 = vadd.f32 %v227_v37, %v127_v16  ;;  %v1165_v16 = vld [vmem:[%s1640_s5 + $0x18] sm:$0xff] }
 0x1b1   :  { %v1256_v39 = vpop.f32.mrf.mxu1 }
 0x1b2   :  { %v232_v40 = vadd.f32 %v1505_v36, %v231_v38 }
 0x1b3   :  { %v1263_v41 = vpop.f32.mrf.mxu1 }
 0x1b4   :  { %1349 = vtanh.f32 %v232_v40 }
 0x1b5   :  { %v315_v42 = vpop.f32.mrf.mxu1 }
 0x1b6   :  { %1266 = vmatprep.mubr.msk.f32.mxu1 %vm35_vm0, %v315_v42 }
 0x1c1   :  { %v1350_v45 = vpop.eup %1349 }
 0x1c2   :  { %v236_v47 = vmul.f32 %v1350_v45, %v1348_v43 }
 0x1c4   :  { %v1510_v48 = vadd.f32 %v236_v47, %v235_v46 }
 0x1c6   :  { %1264 = vmatprep.subr.mxu1 %v1510_v48 }
 0x1c7   :  { %1265 = vmatpush3.msra.mxu1 %v1510_v48 }
 0x1c8   :  { %1267 = vmatmul.mubr.msk.f32.vlgmr.msra.gmra.mxu1 %vm35_vm0, %v1263_v41  ;;  %1269 = vmatprep.subr.mxu1 %v1371_v0 }
 0x1c9   :  { %1270 = vmatpush3.msra.mxu1 %v1510_v48  ;;  %1271 = vmatprep.mubr.msk.f32.mxu1 %vm1372_vm1, %v1371_v0 }
 0x1ca   :  { %1320 = vmatprep.subr.mxu1 %v1371_v0 }
 0x1cc   :  { %1272 = vmatmul.mubr.msk.f32.vlgmr.msra.gmra.mxu1 %vm35_vm0, %v1419_v2 }
 0x1cd   :  { %1274 = vmatprep.mubr.msk.f32.mxu1 %vm1372_vm1, %v1371_v0 }
 0x1d0   :  { %1275 = vmatmul.mubr.msk.f32.gmra.mxu1 %vm35_vm0, %v1438_v4 }
 0x1d1   :  { %1277 = vmatprep.mubr.msk.f32.mxu1 %vm1372_vm1, %v1371_v0 }
 0x1d4   :  { %1278 = vmatmul.mubr.msk.f32.gmra.mxu1 %vm35_vm0, %v1453_v5 }
 0x1d5   :  { %1280 = vmatprep.mubr.msk.f32.mxu1 %vm1372_vm1, %v1371_v0 }
 0x1d8   :  { %1281 = vmatmul.mubr.msk.f32.gmra.mxu1 %vm35_vm0, %v1462_v6 }
 0x1d9   :  { %1283 = vmatprep.mubr.msk.f32.mxu1 %vm1372_vm1, %v1371_v0 }
 0x1dc   :  { %1284 = vmatmul.mubr.msk.f32.gmra.mxu1 %vm35_vm0, %v1426_v3 }
 0x1dd   :  { %1322 = vmatprep.mubr.msk.f32.mxu1 %vm1372_vm1, %v1371_v0 }
 0x288   :  { %v1268_v49 = vpop.f32.mrf.mxu1 }
 0x289   :  { %vm406_vm3 = vcmp.ge.f32.partialorder %v1268_v49, 0.0  ;;  %v408_v50 = vmul.f32 0.0, %v1268_v49 }
 0x28a   :  { %v396_v51 = vpop.f32.mrf.mxu1 }
 0x28b   :  { %v410_v52 = vsel %vm406_vm3, %v1268_v49, %v408_v50  ;;  %vm405_vm5 = vcmp.ge.f32.partialorder %v396_v51, 0.0  ;;  %v407_v53 = vmul.f32 0.0, %v396_v51 }
 0x28c   :  { %413 = vst.msk [vmem:[%s1642_s6 + $0x8] sm:$0xff] %vm411_vm4, %v410_v52  ;;  %v480_v54 = vpop.f32.mrf.mxu1 }
 0x28d   :  { %v409_v55 = vsel %vm405_vm5, %v396_v51, %v407_v53 }
 0x28e   :  { %412 = vst.msk [vmem:[%s1642_s6] sm:$0xff] %vm411_vm4, %v409_v55  ;;  %v1273_v56 = vpop.f32.mrf.mxu1 }
 0x290   :  { %v485_v57 = vpop.f32.mrf.mxu1 }
 0x292   :  { %v1276_v58 = vpop.f32.mrf.mxu1 }
 0x293   :  { %v1180_v58 = vld [vmem:[%s1641_s4 + $0x20] sm:$0xff] }
 0x294   :  { %v490_v59 = vpop.f32.mrf.mxu1 }
 0x296   :  { %v1279_v60 = vpop.f32.mrf.mxu1 }
 0x298   :  { %v495_v61 = vpop.f32.mrf.mxu1 }
 0x299   :  { %v504_v62 = vadd.f32 %v495_v61, %v480_v54 }
 0x29a   :  { %v1282_v63 = vpop.f32.mrf.mxu1 }
 0x29b   :  { %v505_v20 = vadd.f32 %v504_v62, %v1499_v31 }
 0x29c   :  { %v500_v1 = vpop.f32.mrf.mxu1 }
 0x29d   :  { %v512_v7 = vadd.f32 %v500_v1, %v485_v57  ;;  %v1159_v21 = vmul.f32 -1.442695, %v505_v20  ;;  %v1183_v57 = vld [vmem:[%s1640_s5 + $0x28] sm:$0xff] }
 0x29e   :  { %v1285_v8 = vpop.f32.mrf.mxu1 }
 0x29f   :  { %v513_v9 = vadd.f32 %v1471_v10, %v512_v7 }
 0x2a1   :  { %v1160_v11 = vmul.f32 -1.442695, %v513_v9 }
 0x2a3   :  { %1351 = vpow2.f32 %v1160_v11 }
 0x2b0   :  { %v1352_v12 = vpop.eup %1351 }
 0x2b1   :  { %v517_v13 = vadd.f32 1.0, %v1352_v12 }
 0x2b3   :  { %1353 = vrcp.f32 %v517_v13 }
 0x2b4   :  { %1355 = vpow2.f32 %v1159_v21 }
 0x2c0   :  { %v1354_v14 = vpop.eup %1353 }
 0x2c1   :  { %v520_v15 = vmul.f32 %v1354_v14, %v1510_v48  ;;  %v1356_v22 = vpop.eup %1355 }
 0x2c2   :  { %v509_v23 = vadd.f32 1.0, %v1356_v22 }
 0x2c3   :  { %1287 = vmatpush3.msra.mxu0 %v520_v15 }
 0x2c4   :  { %1289 = vmatmul.mubr.msk.f32.vlgmr.msra.gmra.mxu0 %vm35_vm0, %v1478_v26  ;;  %1291 = vmatprep.subr.mxu0 %v1165_v16  ;;  %1357 = vrcp.f32 %v509_v23 }
 0x2c5   :  { %1292 = vmatpush3.msra.mxu0 %v1165_v16  ;;  %1295 = vmatprep.mubr.msk.f32.mxu0 %vm242_vm2, %v1162_v17 }
 0x2c6   :  { %1293 = vmatprep.subr.mxu0 %v1164_v18 }
 0x2c7   :  { %1294 = vmatpush3.msra.mxu0 %v1164_v18 }
 0x2c8   :  { %1296 = vmatmul.mubr.msk.f32.vlgmr.msra.gmra.mxu0 %vm242_vm2, %v1163_v19 }
 0x2d1   :  { %v1358_v32 = vpop.eup %1357 }
 0x2d2   :  { %v594_v33 = vsub.f32 1.0, %v1358_v32 }
 0x2d4   :  { %v595_v35 = vmul.f32 %v594_v33, %v1510_v48 }
 0x384   :  { %v587_v24 = vpop.f32.mrf.mxu0 }
 0x385   :  { %v591_v25 = vadd.f32 %v587_v24, %v490_v59  ;;  %v1181_v59 = vld [vmem:[%s1641_s4 + $0x28] sm:$0xff] }
 0x386   :  { %v1290_v27 = vpop.f32.mrf.mxu0 }
 0x387   :  { %v592_v28 = vadd.f32 %v1505_v36, %v591_v25 }
 0x388   :  { %v1297_v29 = vpop.f32.mrf.mxu0 }
 0x389   :  { %1359 = vtanh.f32 %v592_v28 }
 0x38a   :  { %v676_v30 = vpop.f32.mrf.mxu0 }
 0x38b   :  { %1300 = vmatprep.mubr.msk.f32.mxu0 %vm35_vm0, %v676_v30 }
 0x396   :  { %v1360_v34 = vpop.eup %1359 }
 0x397   :  { %v596_v37 = vmul.f32 %v1360_v34, %v1358_v32 }
 0x399   :  { %v1570_v38 = vadd.f32 %v596_v37, %v595_v35 }
 0x39b   :  { %1298 = vmatprep.subr.mxu0 %v1570_v38 }
 0x39c   :  { %1299 = vmatpush3.msra.mxu0 %v1570_v38 }
 0x39d   :  { %1301 = vmatmul.mubr.msk.f32.vlgmr.msra.gmra.mxu0 %vm35_vm0, %v1297_v29  ;;  %1303 = vmatprep.subr.mxu0 %v1371_v0 }
 0x39e   :  { %1304 = vmatpush3.msra.mxu0 %v1570_v38  ;;  %1305 = vmatprep.mubr.msk.f32.mxu0 %vm1372_vm1, %v1371_v0 }
 0x3a1   :  { %1306 = vmatmul.mubr.msk.f32.vlgmr.msra.gmra.mxu0 %vm35_vm0, %v1419_v2 }
 0x3a2   :  { %1308 = vmatprep.mubr.msk.f32.mxu0 %vm1372_vm1, %v1371_v0 }
 0x3a5   :  { %1309 = vmatmul.mubr.msk.f32.gmra.mxu0 %vm35_vm0, %v1438_v4 }
 0x3a6   :  { %1311 = vmatprep.mubr.msk.f32.mxu0 %vm1372_vm1, %v1371_v0 }
 0x3a9   :  { %1312 = vmatmul.mubr.msk.f32.gmra.mxu0 %vm35_vm0, %v1453_v5 }
 0x3aa   :  { %1314 = vmatprep.mubr.msk.f32.mxu0 %vm1372_vm1, %v1371_v0 }
 0x3ad   :  { %1315 = vmatmul.mubr.msk.f32.gmra.mxu0 %vm35_vm0, %v1462_v6 }
 0x3ae   :  { %1317 = vmatprep.mubr.msk.f32.mxu0 %vm1372_vm1, %v1371_v0 }
 0x3b1   :  { %1318 = vmatmul.mubr.msk.f32.gmra.mxu0 %vm35_vm0, %v1426_v3 }
 0x45d   :  { %v1302_v2 = vpop.f32.mrf.mxu0 }
 0x45e   :  { %vm767_vm6 = vcmp.ge.f32.partialorder %v1302_v2, 0.0  ;;  %v769_v4 = vmul.f32 0.0, %v1302_v2 }
 0x45f   :  { %v757_v39 = vpop.f32.mrf.mxu0 }
 0x460   :  { %v771_v40 = vsel %vm767_vm6, %v1302_v2, %v769_v4  ;;  %vm766_vm7 = vcmp.ge.f32.partialorder %v757_v39, 0.0  ;;  %v768_v41 = vmul.f32 0.0, %v757_v39 }
 0x461   :  { %1171 = vst.msk [vmem:[%s1642_s6 + $0x18] sm:$0xff] %vm411_vm4, %v771_v40  ;;  %v841_v5 = vpop.f32.mrf.mxu0 }
 0x462   :  { %v770_v6 = vsel %vm766_vm7, %v757_v39, %v768_v41 }
 0x463   :  { %1170 = vst.msk [vmem:[%s1642_s6 + $0x10] sm:$0xff] %vm411_vm4, %v770_v6  ;;  %v1307_v0 = vpop.f32.mrf.mxu0 }
 0x465   :  { %v846_v3 = vpop.f32.mrf.mxu0 }
 0x467   :  { %v1310_v42 = vpop.f32.mrf.mxu0 }
 0x469   :  { %v851_v43 = vpop.f32.mrf.mxu0 }
 0x46b   :  { %v1313_v44 = vpop.f32.mrf.mxu0 }
 0x46d   :  { %v856_v45 = vpop.f32.mrf.mxu0 }
 0x46e   :  { %v865_v46 = vadd.f32 %v856_v45, %v841_v5 }
 0x46f   :  { %v1316_v47 = vpop.f32.mrf.mxu0 }
 0x470   :  { %v866_v60 = vadd.f32 %v865_v46, %v1499_v31 }
 0x471   :  { %v861_v48 = vpop.f32.mrf.mxu0 }
 0x472   :  { %v873_v49 = vadd.f32 %v861_v48, %v846_v3  ;;  %v1177_v61 = vmul.f32 -1.442695, %v866_v60 }
 0x473   :  { %v1319_v50 = vpop.f32.mrf.mxu0 }
 0x474   :  { %v874_v51 = vadd.f32 %v1471_v10, %v873_v49  ;;  %v1182_v10 = vld [vmem:[%s1640_s5 + $0x20] sm:$0xff] }
 0x476   :  { %v1178_v52 = vmul.f32 -1.442695, %v874_v51 }
 0x478   :  { %1361 = vpow2.f32 %v1178_v52 }
 0x485   :  { %v1362_v53 = vpop.eup %1361 }
 0x486   :  { %v878_v54 = vadd.f32 1.0, %v1362_v53 }
 0x488   :  { %1363 = vrcp.f32 %v878_v54 }
 0x489   :  { %1365 = vpow2.f32 %v1177_v61 }
 0x495   :  { %v1364_v55 = vpop.eup %1363 }
 0x496   :  { %v881_v56 = vmul.f32 %v1364_v55, %v1570_v38  ;;  %v1366_v62 = vpop.eup %1365 }
 0x497   :  { %v870_v63 = vadd.f32 1.0, %v1366_v62 }
 0x498   :  { %1321 = vmatpush3.msra.mxu1 %v881_v56 }
 0x499   :  { %1323 = vmatmul.mubr.msk.f32.vlgmr.msra.gmra.mxu1 %vm35_vm0, %v1478_v26  ;;  %1325 = vmatprep.subr.mxu1 %v1183_v57  ;;  %1367 = vrcp.f32 %v870_v63 }
 0x49a   :  { %1326 = vmatpush3.msra.mxu1 %v1183_v57  ;;  %1329 = vmatprep.mubr.msk.f32.mxu1 %vm242_vm2, %v1180_v58 }
 0x49b   :  { %1327 = vmatprep.subr.mxu1 %v1182_v10 }
 0x49c   :  { %1328 = vmatpush3.msra.mxu1 %v1182_v10 }
 0x49d   :  { %1330 = vmatmul.mubr.msk.f32.vlgmr.msra.gmra.mxu1 %vm242_vm2, %v1181_v59 }
 0x4a6   :  { %v1368_v12 = vpop.eup %1367 }
 0x4a7   :  { %v955_v13 = vsub.f32 1.0, %v1368_v12 }
 0x4a9   :  { %v956_v31 = vmul.f32 %v955_v13, %v1570_v38 }
 0x559   :  { %v948_v26 = vpop.f32.mrf.mxu1 }
 0x55a   :  { %v952_v1 = vadd.f32 %v948_v26, %v851_v43 }
 0x55b   :  { %v1324_v7 = vpop.f32.mrf.mxu1 }
 0x55c   :  { %v953_v8 = vadd.f32 %v1505_v36, %v952_v1 }
 0x55d   :  { %v1331_v9 = vpop.f32.mrf.mxu1 }
 0x55e   :  { %1369 = vtanh.f32 %v953_v8 }
 0x55f   :  { %v1037_v11 = vpop.f32.mrf.mxu1 }
 0x560   :  { %1334 = vmatprep.mubr.msk.f32.mxu1 %vm35_vm0, %v1037_v11 }
 0x56b   :  { %v1370_v14 = vpop.eup %1369 }
 0x56c   :  { %v957_v15 = vmul.f32 %v1370_v14, %v1368_v12 }
 0x56e   :  { %v958_v16 = vadd.f32 %v957_v15, %v956_v31 }
 0x570   :  { %1332 = vmatprep.subr.mxu1 %v958_v16 }
 0x571   :  { %1333 = vmatpush3.msra.mxu1 %v958_v16 }
 0x572   :  { %1335 = vmatmul.mubr.msk.f32.vlgmr.msra.gmra.mxu1 %vm35_vm0, %v1331_v9 }
 0x632   :  { %v1336_v17 = vpop.f32.mrf.mxu1 }
 0x633   :  { %vm1128_vm8 = vcmp.ge.f32.partialorder %v1336_v17, 0.0  ;;  %v1130_v18 = vmul.f32 0.0, %v1336_v17 }
 0x634   :  { %v1118_v36 = vpop.f32.mrf.mxu1 }
 0x635   :  { %v1132_v19 = vsel %vm1128_vm8, %v1336_v17, %v1130_v18  ;;  %vm1127_vm9 = vcmp.ge.f32.partialorder %v1118_v36, 0.0  ;;  %v1129_v20 = vmul.f32 0.0, %v1118_v36 }
 0x636   :  { %1189 = vst.msk [vmem:[%s1642_s6 + $0x28] sm:$0xff] %vm411_vm4, %v1132_v19 }
 0x637   :  { %v1131_v21 = vsel %vm1127_vm9, %v1118_v36, %v1129_v20 }
 0x638   :  { %1188 = vst.msk [vmem:[%s1642_s6 + $0x20] sm:$0xff] %vm411_vm4, %v1131_v21 }

// kernel: egcn_forward.3
= control target key start
LH: loop header
LB: loop body
LE: loop exit
PB: predicated region body
PF: predicated region fallthrough
CT: control target
= control target key end

     0   :  { %vm65_vm0 = vcmask 261120   ;;  %vm569_vm1 = vcmask 130048   ;;  %s2912_s3 = inlined_call_operand.vmem [shape: f32[32,16], index: 3, kind: input, shape index: {}]   ;;  %s2913_s0 = inlined_call_operand.vmem [shape: f32[160,32], index: 0, kind: input, shape index: {}]   ;;  %s2914_s1 = inlined_call_operand.vmem [shape: f32[32,32], index: 1, kind: input, shape index: {}]   ;;  %s2915_s2 = inlined_call_operand.vmem [shape: f32[3,32,16], index: 2, kind: input, shape index: {}]   ;;  %s2916_s5 = inlined_call_operand.vmem [shape: f32[3,16,32], index: 5, kind: input, shape index: {}]   ;;  %s2917_s4 = inlined_call_operand.vmem [shape: f32[3,16,16], index: 4, kind: input, shape index: {}]   ;;  %s2918_s6 = inlined_call_operand.vmem [shape: f32[3,16,16], index: 6, kind: output, shape index: {}]  }
   0x1   :  { %v2339_v0 = vld [vmem:[%s2912_s3 + $0x18] sm:$0xff]  ;;  %v2344_v1 = vld [vmem:[%s2912_s3 + $0x10] sm:$0xff]  ;;  %v2353_v2 = vld [vmem:[%s2912_s3 + $0x8] sm:$0xff] }
   0x2   :  { %1963 = vmatprep.subr.mxu0 %v2339_v0  ;;  %2173 = vmatprep.subr.mxu1 %v2339_v0  ;;  %v2362_v3 = vld [vmem:[%s2912_s3] sm:$0xff]  ;;  %v2376_v5 = vld [vmem:[%s2913_s0 + $0x8] sm:$0xff]  ;;  %v2384_v6 = vld [vmem:[%s2913_s0 + $0x70] sm:$0xff] }
   0x3   :  { %1964 = vmatpush3.msra.mxu0 %v2339_v0  ;;  %2177 = vmatpush3.msra.mxu1 %v2339_v0  ;;  %v2367_v4 = vld [vmem:[%s2913_s0] sm:$0xff]  ;;  %2925 = vst [vmem:[#allocation2_spill] sm:$0xff] %v2384_v6  ;;  %v2389_v7 = vld [vmem:[%s2913_s0 + $0x10] sm:$0xff]  ;;  %v2396_v8 = vld [vmem:[%s2913_s0 + $0x78] sm:$0xff] }
   0x4   :  { %1965 = vmatprep.subr.mxu0 %v2344_v1  ;;  %2174 = vmatprep.subr.mxu1 %v2344_v1  ;;  %2926 = vst [vmem:[#allocation3_spill] sm:$0xff] %v2396_v8  ;;  %v2404_v9 = vld [vmem:[%s2913_s0 + $0x80] sm:$0xff]  ;;  %v2413_v10 = vld [vmem:[%s2913_s0 + $0x18] sm:$0xff]  ;;  %v2427_v12 = vld [vmem:[%s2913_s0 + $0x88] sm:$0xff] }
   0x5   :  { %1966 = vmatpush3.msra.mxu0 %v2344_v1  ;;  %2178 = vmatpush3.msra.mxu1 %v2344_v1  ;;  %2927 = vst [vmem:[#allocation4_spill] sm:$0xff] %v2404_v9  ;;  %v2420_v11 = vld [vmem:[%s2913_s0 + $0x20] sm:$0xff]  ;;  %2928 = vst [vmem:[#allocation5_spill] sm:$0xff] %v2427_v12  ;;  %v2434_v13 = vld [vmem:[%s2913_s0 + $0x90] sm:$0xff] }
   0x6   :  { %1967 = vmatprep.subr.mxu0 %v2353_v2  ;;  %2175 = vmatprep.subr.mxu1 %v2353_v2  ;;  %2929 = vst [vmem:[#allocation6_spill] sm:$0xff] %v2434_v13  ;;  %v2441_v14 = vld [vmem:[%s2913_s0 + $0x28] sm:$0xff]  ;;  %v2448_v15 = vld [vmem:[%s2913_s0 + $0x30] sm:$0xff]  ;;  %v2455_v16 = vld [vmem:[%s2913_s0 + $0x98] sm:$0xff] }
   0x7   :  { %1968 = vmatpush3.msra.mxu0 %v2353_v2  ;;  %2179 = vmatpush3.msra.mxu1 %v2353_v2  ;;  %2930 = vst [vmem:[#allocation7_spill] sm:$0xff] %v2455_v16  ;;  %v2464_v17 = vld [vmem:[%s2913_s0 + $0x38] sm:$0xff]  ;;  %v2471_v18 = vld [vmem:[%s2913_s0 + $0x40] sm:$0xff]  ;;  %v2480_v19 = vld [vmem:[%s2913_s0 + $0x48] sm:$0xff] }
   0x8   :  { %1969 = vmatprep.subr.mxu0 %v2362_v3  ;;  %1971 = vmatprep.mubr.msk.f32.mxu0 %vm65_vm0, %v2367_v4  ;;  %v2485_v20 = vld [vmem:[%s2913_s0 + $0x50] sm:$0xff]  ;;  %v2494_v21 = vld [vmem:[%s2913_s0 + $0x58] sm:$0xff]  ;;  %v2499_v22 = vld [vmem:[%s2913_s0 + $0x60] sm:$0xff] }
   0x9   :  { %1970 = vmatpush3.msra.mxu0 %v2362_v3  ;;  %2176 = vmatprep.subr.mxu1 %v2362_v3  ;;  %v2508_v23 = vld [vmem:[%s2913_s0 + $0x68] sm:$0xff]  ;;  %v2515_v24 = vld [vmem:[%s2914_s1] sm:$0xff]  ;;  %v2543_v43 = vld [vmem:[%s2915_s2 + $0x38] sm:$0xff] }
   0xa   :  { %1972 = vmatmul.mubr.msk.f32.vlgmr.msra.gmra.mxu0 %vm65_vm0, %v2376_v5  ;;  %2180 = vmatpush3.msra.mxu1 %v2362_v3  ;;  %v2532_v34 = vld [vmem:[%s2915_s2 + $0x28] sm:$0xff]  ;;  %v2537_v38 = vld [vmem:[%s2915_s2 + $0x20] sm:$0xff]  ;;  %v2549_v49 = vld [vmem:[%s2915_s2 + $0x30] sm:$0xff] }
   0xb   :  { %1992 = vmatprep.mubr.msk.f32.mxu1 %vm65_vm0, %v2384_v6  ;;  %1974 = vmatprep.mubr.msk.f32.mxu0 %vm65_vm0, %v2389_v7 }
   0xc   :  { %1993 = vmatmul.mubr.msk.f32.vlgmr.msra.gmra.mxu1 %vm65_vm0, %v2396_v8 }
   0xd   :  { %1995 = vmatprep.mubr.msk.f32.mxu1 %vm65_vm0, %v2404_v9 }
   0xe   :  { %1975 = vmatmul.mubr.msk.f32.gmra.mxu0 %vm65_vm0, %v2413_v10 }
   0xf   :  { %1977 = vmatprep.mubr.msk.f32.mxu0 %vm65_vm0, %v2420_v11 }
  0x10   :  { %1996 = vmatmul.mubr.msk.f32.gmra.mxu1 %vm65_vm0, %v2427_v12 }
  0x11   :  { %1998 = vmatprep.mubr.msk.f32.mxu1 %vm65_vm0, %v2434_v13 }
  0x12   :  { %1978 = vmatmul.mubr.msk.f32.gmra.mxu0 %vm65_vm0, %v2441_v14 }
  0x13   :  { %1980 = vmatprep.mubr.msk.f32.mxu0 %vm65_vm0, %v2448_v15 }
  0x14   :  { %1999 = vmatmul.mubr.msk.f32.gmra.mxu1 %vm65_vm0, %v2455_v16 }
  0x15   :  { %2009 = vmatprep.mubr.msk.f32.mxu1 %vm65_vm0, %v2515_v24 }
  0x16   :  { %1981 = vmatmul.mubr.msk.f32.gmra.mxu0 %vm65_vm0, %v2464_v17 }
  0x17   :  { %1983 = vmatprep.mubr.msk.f32.mxu0 %vm65_vm0, %v2471_v18 }
  0x1a   :  { %1984 = vmatmul.mubr.msk.f32.gmra.mxu0 %vm65_vm0, %v2480_v19 }
  0x1b   :  { %1986 = vmatprep.mubr.msk.f32.mxu0 %vm65_vm0, %v2485_v20 }
  0x1e   :  { %1987 = vmatmul.mubr.msk.f32.gmra.mxu0 %vm65_vm0, %v2494_v21 }
  0x1f   :  { %1989 = vmatprep.mubr.msk.f32.mxu0 %vm65_vm0, %v2499_v22 }
  0x22   :  { %1990 = vmatmul.mubr.msk.f32.gmra.mxu0 %vm65_vm0, %v2508_v23 }
  0x23   :  { %2079 = vmatprep.mubr.msk.f32.mxu0 %vm65_vm0, %v2515_v24 }
  0xca   :  { %v2521_v25 = vpop.f32.mrf.mxu0 }
  0xcc   :  { %v2523_v26 = vpop.f32.mrf.mxu0  ;;  %v1994_v27 = vpop.f32.mrf.mxu1 }
  0xce   :  { %v1976_v28 = vpop.f32.mrf.mxu0  ;;  %v262_v29 = vpop.f32.mrf.mxu1 }
  0xcf   :  { %v2525_v30 = vadd.f32 %v1994_v27, %v1976_v28 }
  0xd0   :  { %v202_v31 = vpop.f32.mrf.mxu0  ;;  %v1997_v32 = vpop.f32.mrf.mxu1 }
  0xd1   :  { %v2527_v33 = vadd.f32 %v262_v29, %v202_v31 }
  0xd2   :  { %v1979_v35 = vpop.f32.mrf.mxu0  ;;  %v272_v36 = vpop.f32.mrf.mxu1 }
  0xd3   :  { %v324_v37 = vadd.f32 %v1997_v32, %v1979_v35 }
  0xd4   :  { %v212_v39 = vpop.f32.mrf.mxu0  ;;  %v2000_v40 = vpop.f32.mrf.mxu1 }
  0xd5   :  { %v328_v41 = vadd.f32 %v2532_v34, %v324_v37  ;;  %v323_v42 = vadd.f32 %v272_v36, %v212_v39 }
  0xd6   :  { %v1982_v44 = vpop.f32.mrf.mxu0  ;;  %v282_v48 = vpop.f32.mrf.mxu1 }
  0xd7   :  { %v1742_v45 = vmul.f32 -1.442695, %v328_v41  ;;  %v327_v46 = vadd.f32 %v2537_v38, %v323_v42  ;;  %v326_v47 = vadd.f32 %v2000_v40, %v1982_v44  ;;  %v2560_v40 = vld [vmem:[%s2914_s1 + $0x8] sm:$0xff]  ;;  %v2565_v41 = vld [vmem:[%s2914_s1 + $0x10] sm:$0xff]  ;;  %v2574_v42 = vld [vmem:[%s2914_s1 + $0x18] sm:$0xff] }
  0xd8   :  { %v222_v50 = vpop.f32.mrf.mxu0  ;;  %v486_v44 = vld [vmem:[%s2916_s5] sm:$0xff] }
  0xd9   :  { %v1741_v51 = vmul.f32 -1.442695, %v327_v46  ;;  %v330_v52 = vadd.f32 %v2543_v43, %v326_v47  ;;  %v325_v53 = vadd.f32 %v282_v48, %v222_v50  ;;  %2181 = vpow2.f32 %v1742_v45 }
  0xda   :  { %v1985_v45 = vpop.f32.mrf.mxu0 }
  0xdb   :  { %v1744_v54 = vmul.f32 -1.442695, %v330_v52  ;;  %v329_v55 = vadd.f32 %v2549_v49, %v325_v53  ;;  %2183 = vpow2.f32 %v1741_v51  ;;  %v2585_v51 = vld [vmem:[%s2915_s2 + $0x18] sm:$0xff]  ;;  %v2590_v53 = vld [vmem:[%s2915_s2 + $0x10] sm:$0xff] }
  0xdc   :  { %v232_v46 = vpop.f32.mrf.mxu0 }
  0xdd   :  { %2185 = vpow2.f32 %v1744_v54  ;;  %v1743_v56 = vmul.f32 -1.442695, %v329_v55  ;;  %v298_v55 = vadd.f32 %v2525_v30, %v2585_v51 }
  0xde   :  { %v1988_v47 = vpop.f32.mrf.mxu0 }
  0xdf   :  { %2187 = vpow2.f32 %v1743_v56  ;;  %v2598_v56 = vld [vmem:[%s2915_s2 + $0x8] sm:$0xff] }
  0xe0   :  { %v242_v48 = vpop.f32.mrf.mxu0 }
  0xe2   :  { %v1991_v50 = vpop.f32.mrf.mxu0 }
  0xe3   :  { %v292_v54 = vadd.f32 %v1991_v50, %v2521_v25  ;;  %v2618_v50 = vld [vmem:[%s2915_s2 + $0x40] sm:$0xff] }
  0xe4   :  { %v252_v52 = vpop.f32.mrf.mxu0 }
  0xe5   :  { %v296_v25 = vadd.f32 %v292_v54, %v2598_v56 }
  0xe6   :  { %v2182_v57 = vpop.eup %2181 }
  0xe7   :  { %v344_v60 = vadd.f32 1.0, %v2182_v57  ;;  %v291_v57 = vadd.f32 %v252_v52, %v2523_v26 }
  0xe8   :  { %v2184_v58 = vpop.eup %2183 }
  0xe9   :  { %v343_v63 = vadd.f32 1.0, %v2184_v58  ;;  %v297_v58 = vadd.f32 %v2527_v33, %v2590_v53 }
  0xea   :  { %v2186_v59 = vpop.eup %2185 }
  0xeb   :  { %v346_v61 = vadd.f32 1.0, %v2186_v59  ;;  %v2606_v59 = vld [vmem:[%s2915_s2] sm:$0xff] }
  0xec   :  { %v2188_v62 = vpop.eup %2187  ;;  %v295_v30 = vadd.f32 %v291_v57, %v2606_v59 }
  0xed   :  { %2189 = vrcp.f32 %v346_v61  ;;  %v345_v27 = vadd.f32 1.0, %v2188_v62  ;;  %v1739_v61 = vmul.f32 -1.442695, %v297_v58  ;;  %v1738_v62 = vmul.f32 -1.442695, %v296_v25  ;;  %v2630_v25 = vld [vmem:[%s2915_s2 + $0x50] sm:$0xff] }
  0xee   :  { %2191 = vrcp.f32 %v344_v60  ;;  %v1740_v60 = vmul.f32 -1.442695, %v298_v55  ;;  %v2624_v55 = vld [vmem:[%s2915_s2 + $0x58] sm:$0xff] }
  0xef   :  { %2193 = vrcp.f32 %v345_v27 }
  0xf0   :  { %2195 = vrcp.f32 %v343_v63  ;;  %v1737_v63 = vmul.f32 -1.442695, %v295_v30 }
  0xf1   :  { %2197 = vpow2.f32 %v1740_v60 }
  0xf2   :  { %2199 = vpow2.f32 %v1739_v61 }
  0xf3   :  { %2201 = vpow2.f32 %v1738_v62 }
  0xf4   :  { %2203 = vpow2.f32 %v1737_v63 }
  0xfa   :  { %v2190_v28 = vpop.eup %2189 }
  0xfb   :  { %v2192_v29 = vpop.eup %2191  ;;  %v358_v31 = vmul.f32 %v2190_v28, %v2339_v0 }
  0xfc   :  { %v2194_v32 = vpop.eup %2193  ;;  %v356_v37 = vmul.f32 %v2192_v29, %v2353_v2 }
  0xfd   :  { %2001 = vmatprep.subr.mxu1 %v358_v31  ;;  %v357_v35 = vmul.f32 %v2194_v32, %v2344_v1  ;;  %v2196_v36 = vpop.eup %2195 }
  0xfe   :  { %2002 = vmatpush3.msra.mxu1 %v358_v31  ;;  %v355_v39 = vmul.f32 %v2196_v36, %v2362_v3  ;;  %v2198_v26 = vpop.eup %2197 }
  0xff   :  { %2003 = vmatprep.subr.mxu1 %v357_v35  ;;  %v2200_v27 = vpop.eup %2199  ;;  %v314_v28 = vadd.f32 1.0, %v2198_v26 }
 0x100   :  { %2004 = vmatpush3.msra.mxu1 %v357_v35  ;;  %v2202_v33 = vpop.eup %2201  ;;  %v313_v31 = vadd.f32 1.0, %v2200_v27  ;;  %v2613_v35 = vld [vmem:[%s2915_s2 + $0x48] sm:$0xff] }
 0x101   :  { %2005 = vmatprep.subr.mxu1 %v356_v37  ;;  %v2204_v29 = vpop.eup %2203  ;;  %2205 = vrcp.f32 %v314_v28 }
 0x102   :  { %2006 = vmatpush3.msra.mxu1 %v356_v37  ;;  %v312_v37 = vadd.f32 1.0, %v2202_v33  ;;  %2207 = vrcp.f32 %v313_v31 }
 0x103   :  { %2007 = vmatprep.subr.mxu1 %v355_v39 }
 0x104   :  { %2008 = vmatpush3.msra.mxu1 %v355_v39  ;;  %2209 = vrcp.f32 %v312_v37 }
 0x105   :  { %2010 = vmatmul.mubr.msk.f32.vlgmr.msra.gmra.mxu1 %vm65_vm0, %v2560_v40 }
 0x106   :  { %2012 = vmatprep.mubr.msk.f32.mxu1 %vm65_vm0, %v2565_v41 }
 0x109   :  { %2013 = vmatmul.mubr.msk.f32.gmra.mxu1 %vm65_vm0, %v2574_v42 }
 0x10a   :  { %2023 = vmatprep.mubr.msk.f32.mxu1 %vm65_vm0, %v486_v44  ;;  %v311_v44 = vadd.f32 1.0, %v2204_v29 }
 0x10c   :  { %2211 = vrcp.f32 %v311_v44 }
 0x1c5   :  { %v2011_v32 = vpop.f32.mrf.mxu1 }
 0x1c6   :  { %v457_v36 = vadd.f32 %v2011_v32, %v1985_v45 }
 0x1c7   :  { %v437_v39 = vpop.f32.mrf.mxu1 }
 0x1c8   :  { %v456_v52 = vadd.f32 %v437_v39, %v232_v46  ;;  %v461_v54 = vadd.f32 %v2613_v35, %v457_v36 }
 0x1c9   :  { %v2014_v57 = vpop.f32.mrf.mxu1 }
 0x1ca   :  { %v459_v45 = vadd.f32 %v2014_v57, %v1988_v47  ;;  %v460_v58 = vadd.f32 %v2618_v50, %v456_v52  ;;  %2213 = vtanh.f32 %v461_v54  ;;  %v2206_v47 = vpop.eup %2205 }
 0x1cb   :  { %v447_v60 = vpop.f32.mrf.mxu1  ;;  %v2208_v62 = vpop.eup %2207  ;;  %v471_v26 = vsub.f32 1.0, %v2206_v47 }
 0x1cc   :  { %v463_v46 = vadd.f32 %v2624_v55, %v459_v45  ;;  %v458_v30 = vadd.f32 %v447_v60, %v242_v48  ;;  %v2210_v63 = vpop.eup %2209  ;;  %v470_v33 = vsub.f32 1.0, %v2208_v62 }
 0x1cd   :  { %v2212_v27 = vpop.eup %2211  ;;  %v475_v36 = vmul.f32 %v471_v26, %v2339_v0  ;;  %v469_v37 = vsub.f32 1.0, %v2210_v63 }
 0x1ce   :  { %2215 = vtanh.f32 %v463_v46  ;;  %v462_v61 = vadd.f32 %v2630_v25, %v458_v30  ;;  %v474_v39 = vmul.f32 %v470_v33, %v2344_v1  ;;  %v468_v57 = vsub.f32 1.0, %v2212_v27 }
 0x1cf   :  { %2217 = vtanh.f32 %v460_v58  ;;  %v473_v60 = vmul.f32 %v469_v37, %v2353_v2  ;;  %v487_v2 = vld [vmem:[%s2916_s5 + $0x8] sm:$0xff] }
 0x1d0   :  { %2219 = vtanh.f32 %v462_v61  ;;  %v472_v1 = vmul.f32 %v468_v57, %v2362_v3  ;;  %v484_v3 = vld [vmem:[%s2917_s4] sm:$0xff] }
 0x1d7   :  { %v2214_v28 = vpop.eup %2213 }
 0x1d8   :  { %v477_v44 = vmul.f32 %v2214_v28, %v2210_v63 }
 0x1da   :  { %v2644_v0 = vadd.f32 %v477_v44, %v473_v60 }
 0x1db   :  { %v2216_v29 = vpop.eup %2215 }
 0x1dc   :  { %v2218_v31 = vpop.eup %2217  ;;  %v479_v32 = vmul.f32 %v2216_v29, %v2206_v47  ;;  %v485_v47 = vld [vmem:[%s2917_s4 + $0x8] sm:$0xff] }
 0x1dd   :  { %v2220_v48 = vpop.eup %2219  ;;  %v476_v45 = vmul.f32 %v2218_v31, %v2212_v27 }
 0x1de   :  { %v478_v52 = vmul.f32 %v2220_v48, %v2208_v62  ;;  %v2636_v54 = vadd.f32 %v479_v32, %v475_v36 }
 0x1df   :  { %v2649_v46 = vadd.f32 %v476_v45, %v472_v1 }
 0x1e0   :  { %2015 = vmatprep.subr.mxu1 %v2636_v54  ;;  %v2639_v58 = vadd.f32 %v478_v52, %v474_v39 }
 0x1e1   :  { %2016 = vmatpush3.msra.mxu1 %v2636_v54 }
 0x1e2   :  { %2017 = vmatprep.subr.mxu1 %v2639_v58 }
 0x1e3   :  { %2018 = vmatpush3.msra.mxu1 %v2639_v58 }
 0x1e4   :  { %2019 = vmatprep.subr.mxu1 %v2644_v0 }
 0x1e5   :  { %2020 = vmatpush3.msra.mxu1 %v2644_v0 }
 0x1e6   :  { %2021 = vmatprep.subr.mxu1 %v2649_v46 }
 0x1e7   :  { %2022 = vmatpush3.msra.mxu1 %v2649_v46 }
 0x1e8   :  { %2024 = vmatmul.mubr.msk.f32.vlgmr.msra.gmra.mxu1 %vm65_vm0, %v487_v2 }
 0x1e9   :  { %2030 = vmatprep.mubr.msk.f32.mxu1 %vm569_vm1, %v484_v3 }
 0x2a8   :  { %v2025_v30 = vpop.f32.mrf.mxu1 }
 0x2a9   :  { %2026 = vmatprep.subr.mxu1 %v2025_v30 }
 0x2aa   :  { %v560_v61 = vpop.f32.mrf.mxu1  ;;  %2027 = vmatpush3.msra.mxu1 %v2025_v30 }
 0x2ab   :  { %2028 = vmatprep.subr.mxu1 %v560_v61 }
 0x2ac   :  { %2029 = vmatpush3.msra.mxu1 %v560_v61 }
 0x2ad   :  { %2031 = vmatmul.mubr.msk.f32.vlgmr.msra.gmra.mxu1 %vm569_vm1, %v485_v47  ;;  %2033 = vmatprep.subr.mxu1 %v2636_v54 }
 0x2ae   :  { %2034 = vmatpush3.msra.mxu1 %v2636_v54  ;;  %2041 = vmatprep.mubr.msk.f32.mxu1 %vm65_vm0, %v2367_v4 }
 0x2af   :  { %2035 = vmatprep.subr.mxu1 %v2639_v58 }
 0x2b0   :  { %2036 = vmatpush3.msra.mxu1 %v2639_v58 }
 0x2b1   :  { %2037 = vmatprep.subr.mxu1 %v2644_v0 }
 0x2b2   :  { %2038 = vmatpush3.msra.mxu1 %v2644_v0 }
 0x2b3   :  { %2039 = vmatprep.subr.mxu1 %v2649_v46 }
 0x2b4   :  { %2040 = vmatpush3.msra.mxu1 %v2649_v46 }
 0x2b5   :  { %2042 = vmatmul.mubr.msk.f32.vlgmr.msra.gmra.mxu1 %vm65_vm0, %v2376_v5 }
 0x2b6   :  { %2044 = vmatprep.mubr.msk.f32.mxu1 %vm65_vm0, %v2389_v7 }
 0x2b9   :  { %2045 = vmatmul.mubr.msk.f32.gmra.mxu1 %vm65_vm0, %v2413_v10 }
 0x2ba   :  { %2047 = vmatprep.mubr.msk.f32.mxu1 %vm65_vm0, %v2420_v11 }
 0x2bd   :  { %2048 = vmatmul.mubr.msk.f32.gmra.mxu1 %vm65_vm0, %v2441_v14 }
 0x2be   :  { %2050 = vmatprep.mubr.msk.f32.mxu1 %vm65_vm0, %v2448_v15 }
 0x2c1   :  { %2051 = vmatmul.mubr.msk.f32.gmra.mxu1 %vm65_vm0, %v2464_v17 }
 0x2c2   :  { %2053 = vmatprep.mubr.msk.f32.mxu1 %vm65_vm0, %v2471_v18 }
 0x2c5   :  { %2054 = vmatmul.mubr.msk.f32.gmra.mxu1 %vm65_vm0, %v2480_v19 }
 0x2c6   :  { %2056 = vmatprep.mubr.msk.f32.mxu1 %vm65_vm0, %v2485_v20 }
 0x2c9   :  { %2057 = vmatmul.mubr.msk.f32.gmra.mxu1 %vm65_vm0, %v2494_v21 }
 0x2ca   :  { %2059 = vmatprep.mubr.msk.f32.mxu1 %vm65_vm0, %v2499_v22 }
 0x2cd   :  { %2060 = vmatmul.mubr.msk.f32.gmra.mxu1 %vm65_vm0, %v2508_v23 }
 0x2ce   :  { %2062 = vmatprep.mubr.msk.f32.mxu1 %vm65_vm0, %v2384_v6 }
 0x2d1   :  { %2063 = vmatmul.mubr.msk.f32.gmra.mxu1 %vm65_vm0, %v2396_v8 }
 0x2d2   :  { %2065 = vmatprep.mubr.msk.f32.mxu1 %vm65_vm0, %v2404_v9 }
 0x2d5   :  { %2066 = vmatmul.mubr.msk.f32.gmra.mxu1 %vm65_vm0, %v2427_v12 }
 0x2d6   :  { %2068 = vmatprep.mubr.msk.f32.mxu1 %vm65_vm0, %v2434_v13 }
 0x2d9   :  { %2069 = vmatmul.mubr.msk.f32.gmra.mxu1 %vm65_vm0, %v2455_v16 }
 0x2da   :  { %2149 = vmatprep.mubr.msk.f32.mxu1 %vm65_vm0, %v2515_v24 }
 0x36d   :  { %v2032_v62 = vpop.f32.mrf.mxu1 }
 0x36e   :  { %vm652_vm2 = vcmp.ge.f32.partialorder %v2032_v62, 0.0  ;;  %v654_v63 = vmul.f32 0.0, %v2032_v62 }
 0x36f   :  { %v642_v26 = vpop.f32.mrf.mxu1 }
 0x370   :  { %v656_v27 = vsel %vm652_vm2, %v2032_v62, %v654_v63  ;;  %vm651_vm3 = vcmp.ge.f32.partialorder %v642_v26, 0.0  ;;  %v653_v33 = vmul.f32 0.0, %v642_v26 }
 0x371   :  { %658 = vst.msk [vmem:[%s2918_s6 + $0x8] sm:$0xff] %vm569_vm1, %v656_v27 }
 0x372   :  { %v655_v28 = vsel %vm651_vm3, %v642_v26, %v653_v33 }
 0x373   :  { %657 = vst.msk [vmem:[%s2918_s6] sm:$0xff] %vm569_vm1, %v655_v28 }
 0x375   :  { %v2043_v29 = vpop.f32.mrf.mxu1 }
 0x377   :  { %v725_v24 = vpop.f32.mrf.mxu1 }
 0x379   :  { %v2046_v31 = vpop.f32.mrf.mxu1 }
 0x37b   :  { %v735_v32 = vpop.f32.mrf.mxu1 }
 0x37d   :  { %v2049_v36 = vpop.f32.mrf.mxu1 }
 0x37f   :  { %v745_v37 = vpop.f32.mrf.mxu1 }
 0x381   :  { %v2052_v48 = vpop.f32.mrf.mxu1 }
 0x383   :  { %v755_v39 = vpop.f32.mrf.mxu1 }
 0x385   :  { %v2724_v44 = vpop.f32.mrf.mxu1 }
 0x387   :  { %v2726_v52 = vpop.f32.mrf.mxu1 }
 0x389   :  { %v2728_v57 = vpop.f32.mrf.mxu1 }
 0x38b   :  { %v2730_v45 = vpop.f32.mrf.mxu1 }
 0x38d   :  { %v2061_v60 = vpop.f32.mrf.mxu1 }
 0x38e   :  { %v825_v1 = vadd.f32 %v2061_v60, %v2043_v29 }
 0x38f   :  { %v785_v2 = vpop.f32.mrf.mxu1 }
 0x390   :  { %v824_v3 = vadd.f32 %v785_v2, %v725_v24 }
 0x391   :  { %v2064_v30 = vpop.f32.mrf.mxu1 }
 0x392   :  { %v827_v61 = vadd.f32 %v2064_v30, %v2046_v31 }
 0x393   :  { %v795_v47 = vpop.f32.mrf.mxu1 }
 0x394   :  { %v826_v62 = vadd.f32 %v795_v47, %v735_v32 }
 0x395   :  { %v2067_v63 = vpop.f32.mrf.mxu1 }
 0x396   :  { %v857_v26 = vadd.f32 %v2067_v63, %v2049_v36 }
 0x397   :  { %v805_v27 = vpop.f32.mrf.mxu1 }
 0x398   :  { %v861_v33 = vadd.f32 %v2532_v34, %v857_v26  ;;  %v856_v28 = vadd.f32 %v805_v27, %v745_v37 }
 0x399   :  { %v2070_v16 = vpop.f32.mrf.mxu1 }
 0x39a   :  { %v1778_v13 = vmul.f32 -1.442695, %v861_v33  ;;  %v860_v12 = vadd.f32 %v2537_v38, %v856_v28  ;;  %v859_v9 = vadd.f32 %v2070_v16, %v2052_v48  ;;  %v1787_v33 = vld [vmem:[%s2916_s5 + $0x10] sm:$0xff]  ;;  %v831_v28 = vadd.f32 %v827_v61, %v2585_v51 }
 0x39b   :  { %v815_v8 = vpop.f32.mrf.mxu1 }
 0x39c   :  { %v1777_v6 = vmul.f32 -1.442695, %v860_v12  ;;  %v863_v29 = vadd.f32 %v2543_v43, %v859_v9  ;;  %v858_v24 = vadd.f32 %v815_v8, %v755_v39  ;;  %2221 = vpow2.f32 %v1778_v13 }
 0x39e   :  { %v1780_v31 = vmul.f32 -1.442695, %v863_v29  ;;  %v862_v32 = vadd.f32 %v2549_v49, %v858_v24  ;;  %2223 = vpow2.f32 %v1777_v6  ;;  %v830_v29 = vadd.f32 %v826_v62, %v2590_v53 }
 0x39f   :  { %v829_v24 = vadd.f32 %v825_v1, %v2598_v56 }
 0x3a0   :  { %2225 = vpow2.f32 %v1780_v31  ;;  %v1779_v36 = vmul.f32 -1.442695, %v862_v32  ;;  %v828_v31 = vadd.f32 %v824_v3, %v2606_v59  ;;  %v1776_v32 = vmul.f32 -1.442695, %v831_v28 }
 0x3a2   :  { %2227 = vpow2.f32 %v1779_v36  ;;  %v1775_v36 = vmul.f32 -1.442695, %v830_v29 }
 0x3a9   :  { %v2222_v60 = vpop.eup %2221 }
 0x3aa   :  { %v877_v30 = vadd.f32 1.0, %v2222_v60  ;;  %v1774_v60 = vmul.f32 -1.442695, %v829_v24 }
 0x3ab   :  { %v2224_v37 = vpop.eup %2223 }
 0x3ac   :  { %v876_v16 = vadd.f32 1.0, %v2224_v37  ;;  %v1773_v37 = vmul.f32 -1.442695, %v828_v31 }
 0x3ad   :  { %v2226_v2 = vpop.eup %2225 }
 0x3ae   :  { %v879_v47 = vadd.f32 1.0, %v2226_v2 }
 0x3af   :  { %v2228_v63 = vpop.eup %2227 }
 0x3b0   :  { %2229 = vrcp.f32 %v879_v47  ;;  %v878_v12 = vadd.f32 1.0, %v2228_v63 }
 0x3b1   :  { %2231 = vrcp.f32 %v877_v30 }
 0x3b2   :  { %2233 = vrcp.f32 %v878_v12 }
 0x3b3   :  { %2235 = vrcp.f32 %v876_v16 }
 0x3b4   :  { %2237 = vpow2.f32 %v1776_v32 }
 0x3b5   :  { %2239 = vpow2.f32 %v1775_v36 }
 0x3b6   :  { %2241 = vpow2.f32 %v1774_v60 }
 0x3b7   :  { %2243 = vpow2.f32 %v1773_v37 }
 0x3bd   :  { %v2230_v8 = vpop.eup %2229 }
 0x3be   :  { %v2232_v9 = vpop.eup %2231  ;;  %v891_v13 = vmul.f32 %v2230_v8, %v2636_v54 }
 0x3bf   :  { %v2234_v6 = vpop.eup %2233  ;;  %v889_v26 = vmul.f32 %v2232_v9, %v2644_v0 }
 0x3c0   :  { %2071 = vmatprep.subr.mxu0 %v891_v13  ;;  %v890_v48 = vmul.f32 %v2234_v6, %v2639_v58  ;;  %v2236_v39 = vpop.eup %2235 }
 0x3c1   :  { %2072 = vmatpush3.msra.mxu0 %v891_v13  ;;  %v888_v27 = vmul.f32 %v2236_v39, %v2649_v46  ;;  %v2238_v2 = vpop.eup %2237 }
 0x3c2   :  { %2073 = vmatprep.subr.mxu0 %v890_v48  ;;  %v2240_v30 = vpop.eup %2239  ;;  %v847_v63 = vadd.f32 1.0, %v2238_v2 }
 0x3c3   :  { %2074 = vmatpush3.msra.mxu0 %v890_v48  ;;  %v2242_v47 = vpop.eup %2241  ;;  %v846_v12 = vadd.f32 1.0, %v2240_v30 }
 0x3c4   :  { %2075 = vmatprep.subr.mxu0 %v889_v26  ;;  %v2244_v16 = vpop.eup %2243  ;;  %v845_v1 = vadd.f32 1.0, %v2242_v47  ;;  %2245 = vrcp.f32 %v847_v63 }
 0x3c5   :  { %2076 = vmatpush3.msra.mxu0 %v889_v26  ;;  %v844_v3 = vadd.f32 1.0, %v2244_v16  ;;  %2247 = vrcp.f32 %v846_v12 }
 0x3c6   :  { %2077 = vmatprep.subr.mxu0 %v888_v27  ;;  %2249 = vrcp.f32 %v845_v1 }
 0x3c7   :  { %2078 = vmatpush3.msra.mxu0 %v888_v27  ;;  %2251 = vrcp.f32 %v844_v3 }
 0x3c8   :  { %2080 = vmatmul.mubr.msk.f32.vlgmr.msra.gmra.mxu0 %vm65_vm0, %v2560_v40 }
 0x3c9   :  { %2082 = vmatprep.mubr.msk.f32.mxu0 %vm65_vm0, %v2565_v41 }
 0x3cc   :  { %2083 = vmatmul.mubr.msk.f32.gmra.mxu0 %vm65_vm0, %v2574_v42 }
 0x3cd   :  { %2093 = vmatprep.mubr.msk.f32.mxu0 %vm65_vm0, %v1787_v33 }
 0x488   :  { %v2081_v61 = vpop.f32.mrf.mxu0 }
 0x489   :  { %v978_v62 = vadd.f32 %v2081_v61, %v2724_v44 }
 0x48a   :  { %v958_v8 = vpop.f32.mrf.mxu0 }
 0x48b   :  { %v977_v9 = vadd.f32 %v958_v8, %v2726_v52  ;;  %v982_v13 = vadd.f32 %v2613_v35, %v978_v62  ;;  %v2246_v52 = vpop.eup %2245 }
 0x48c   :  { %v2084_v6 = vpop.f32.mrf.mxu0  ;;  %v2248_v28 = vpop.eup %2247  ;;  %v992_v24 = vsub.f32 1.0, %v2246_v52 }
 0x48d   :  { %v980_v48 = vadd.f32 %v2084_v6, %v2728_v57  ;;  %v981_v39 = vadd.f32 %v2618_v50, %v977_v9  ;;  %2253 = vtanh.f32 %v982_v13  ;;  %v2250_v29 = vpop.eup %2249  ;;  %v991_v32 = vsub.f32 1.0, %v2248_v28  ;;  %v1786_v6 = vld [vmem:[%s2917_s4 + $0x18] sm:$0xff] }
 0x48e   :  { %v968_v26 = vpop.f32.mrf.mxu0  ;;  %v2252_v57 = vpop.eup %2251  ;;  %v996_v2 = vmul.f32 %v992_v24, %v2636_v54  ;;  %v990_v30 = vsub.f32 1.0, %v2250_v29 }
 0x48f   :  { %v984_v27 = vadd.f32 %v2624_v55, %v980_v48  ;;  %v979_v44 = vadd.f32 %v968_v26, %v2730_v45  ;;  %v989_v47 = vsub.f32 1.0, %v2252_v57  ;;  %v995_v12 = vmul.f32 %v991_v32, %v2639_v58 }
 0x490   :  { %v994_v8 = vmul.f32 %v990_v30, %v2644_v0  ;;  %v1788_v0 = vld [vmem:[%s2916_s5 + $0x18] sm:$0xff] }
 0x491   :  { %2255 = vtanh.f32 %v984_v27  ;;  %v983_v33 = vadd.f32 %v2630_v25, %v979_v44  ;;  %v993_v3 = vmul.f32 %v989_v47, %v2649_v46  ;;  %v1785_v46 = vld [vmem:[%s2917_s4 + $0x10] sm:$0xff] }
 0x492   :  { %2257 = vtanh.f32 %v981_v39 }
 0x493   :  { %2259 = vtanh.f32 %v983_v33 }
 0x49a   :  { %v2254_v31 = vpop.eup %2253 }
 0x49b   :  { %v998_v63 = vmul.f32 %v2254_v31, %v2250_v29 }
 0x49d   :  { %v2772_v54 = vadd.f32 %v998_v63, %v994_v8 }
 0x49e   :  { %v2256_v36 = vpop.eup %2255 }
 0x49f   :  { %v2258_v60 = vpop.eup %2257  ;;  %v1000_v37 = vmul.f32 %v2256_v36, %v2246_v52 }
 0x4a0   :  { %v2260_v45 = vpop.eup %2259  ;;  %v997_v62 = vmul.f32 %v2258_v60, %v2252_v57 }
 0x4a1   :  { %v999_v16 = vmul.f32 %v2260_v45, %v2248_v28  ;;  %v2763_v61 = vadd.f32 %v1000_v37, %v996_v2 }
 0x4a2   :  { %v2777_v58 = vadd.f32 %v997_v62, %v993_v3 }
 0x4a3   :  { %2085 = vmatprep.subr.mxu0 %v2763_v61  ;;  %v2767_v1 = vadd.f32 %v999_v16, %v995_v12 }
 0x4a4   :  { %2086 = vmatpush3.msra.mxu0 %v2763_v61 }
 0x4a5   :  { %2087 = vmatprep.subr.mxu0 %v2767_v1 }
 0x4a6   :  { %2088 = vmatpush3.msra.mxu0 %v2767_v1 }
 0x4a7   :  { %2089 = vmatprep.subr.mxu0 %v2772_v54 }
 0x4a8   :  { %2090 = vmatpush3.msra.mxu0 %v2772_v54 }
 0x4a9   :  { %2091 = vmatprep.subr.mxu0 %v2777_v58 }
 0x4aa   :  { %2092 = vmatpush3.msra.mxu0 %v2777_v58 }
 0x4ab   :  { %2094 = vmatmul.mubr.msk.f32.vlgmr.msra.gmra.mxu0 %vm65_vm0, %v1788_v0 }
 0x4ac   :  { %2100 = vmatprep.mubr.msk.f32.mxu0 %vm569_vm1, %v1785_v46 }
 0x56b   :  { %v2095_v9 = vpop.f32.mrf.mxu0 }
 0x56c   :  { %2096 = vmatprep.subr.mxu0 %v2095_v9 }
 0x56d   :  { %v1083_v13 = vpop.f32.mrf.mxu0  ;;  %2097 = vmatpush3.msra.mxu0 %v2095_v9 }
 0x56e   :  { %2098 = vmatprep.subr.mxu0 %v1083_v13 }
 0x56f   :  { %2099 = vmatpush3.msra.mxu0 %v1083_v13 }
 0x570   :  { %2101 = vmatmul.mubr.msk.f32.vlgmr.msra.gmra.mxu0 %vm569_vm1, %v1786_v6  ;;  %2103 = vmatprep.subr.mxu0 %v2763_v61 }
 0x571   :  { %2104 = vmatpush3.msra.mxu0 %v2763_v61  ;;  %2111 = vmatprep.mubr.msk.f32.mxu0 %vm65_vm0, %v2367_v4  ;;  %v2931_v4 = vld [vmem:[#allocation2_spill] sm:$0xff] }
 0x572   :  { %2105 = vmatprep.subr.mxu0 %v2767_v1 }
 0x573   :  { %2106 = vmatpush3.msra.mxu0 %v2767_v1 }
 0x574   :  { %2107 = vmatprep.subr.mxu0 %v2772_v54 }
 0x575   :  { %2108 = vmatpush3.msra.mxu0 %v2772_v54 }
 0x576   :  { %2109 = vmatprep.subr.mxu0 %v2777_v58 }
 0x577   :  { %2110 = vmatpush3.msra.mxu0 %v2777_v58 }
 0x578   :  { %2112 = vmatmul.mubr.msk.f32.vlgmr.msra.gmra.mxu0 %vm65_vm0, %v2376_v5  ;;  %v2932_v5 = vld [vmem:[#allocation3_spill] sm:$0xff] }
 0x579   :  { %2114 = vmatprep.mubr.msk.f32.mxu0 %vm65_vm0, %v2389_v7  ;;  %v2933_v7 = vld [vmem:[#allocation4_spill] sm:$0xff] }
 0x57c   :  { %2115 = vmatmul.mubr.msk.f32.gmra.mxu0 %vm65_vm0, %v2413_v10  ;;  %v2934_v10 = vld [vmem:[#allocation5_spill] sm:$0xff] }
 0x57d   :  { %2117 = vmatprep.mubr.msk.f32.mxu0 %vm65_vm0, %v2420_v11  ;;  %v2935_v11 = vld [vmem:[#allocation6_spill] sm:$0xff] }
 0x580   :  { %2118 = vmatmul.mubr.msk.f32.gmra.mxu0 %vm65_vm0, %v2441_v14  ;;  %v2936_v14 = vld [vmem:[#allocation7_spill] sm:$0xff] }
 0x581   :  { %2120 = vmatprep.mubr.msk.f32.mxu0 %vm65_vm0, %v2448_v15 }
 0x584   :  { %2121 = vmatmul.mubr.msk.f32.gmra.mxu0 %vm65_vm0, %v2464_v17 }
 0x585   :  { %2123 = vmatprep.mubr.msk.f32.mxu0 %vm65_vm0, %v2471_v18 }
 0x588   :  { %2124 = vmatmul.mubr.msk.f32.gmra.mxu0 %vm65_vm0, %v2480_v19 }
 0x589   :  { %2126 = vmatprep.mubr.msk.f32.mxu0 %vm65_vm0, %v2485_v20 }
 0x58c   :  { %2127 = vmatmul.mubr.msk.f32.gmra.mxu0 %vm65_vm0, %v2494_v21 }
 0x58d   :  { %2129 = vmatprep.mubr.msk.f32.mxu0 %vm65_vm0, %v2499_v22 }
 0x590   :  { %2130 = vmatmul.mubr.msk.f32.gmra.mxu0 %vm65_vm0, %v2508_v23 }
 0x591   :  { %2132 = vmatprep.mubr.msk.f32.mxu0 %vm65_vm0, %v2931_v4 }
 0x594   :  { %2133 = vmatmul.mubr.msk.f32.gmra.mxu0 %vm65_vm0, %v2932_v5 }
 0x595   :  { %2135 = vmatprep.mubr.msk.f32.mxu0 %vm65_vm0, %v2933_v7 }
 0x598   :  { %2136 = vmatmul.mubr.msk.f32.gmra.mxu0 %vm65_vm0, %v2934_v10 }
 0x599   :  { %2138 = vmatprep.mubr.msk.f32.mxu0 %vm65_vm0, %v2935_v11 }
 0x59c   :  { %2139 = vmatmul.mubr.msk.f32.gmra.mxu0 %vm65_vm0, %v2936_v14 }
 0x630   :  { %v2102_v15 = vpop.f32.mrf.mxu0 }
 0x631   :  { %vm1174_vm4 = vcmp.ge.f32.partialorder %v2102_v15, 0.0  ;;  %v1176_v17 = vmul.f32 0.0, %v2102_v15 }
 0x632   :  { %v1164_v18 = vpop.f32.mrf.mxu0 }
 0x633   :  { %v1178_v19 = vsel %vm1174_vm4, %v2102_v15, %v1176_v17  ;;  %vm1173_vm5 = vcmp.ge.f32.partialorder %v1164_v18, 0.0  ;;  %v1175_v20 = vmul.f32 0.0, %v1164_v18 }
 0x634   :  { %1794 = vst.msk [vmem:[%s2918_s6 + $0x18] sm:$0xff] %vm569_vm1, %v1178_v19 }
 0x635   :  { %v1177_v21 = vsel %vm1173_vm5, %v1164_v18, %v1175_v20 }
 0x636   :  { %1793 = vst.msk [vmem:[%s2918_s6 + $0x10] sm:$0xff] %vm569_vm1, %v1177_v21 }
 0x638   :  { %v2113_v22 = vpop.f32.mrf.mxu0 }
 0x63a   :  { %v1248_v23 = vpop.f32.mrf.mxu0 }
 0x63c   :  { %v2116_v48 = vpop.f32.mrf.mxu0 }
 0x63e   :  { %v1258_v39 = vpop.f32.mrf.mxu0 }
 0x640   :  { %v2119_v26 = vpop.f32.mrf.mxu0 }
 0x642   :  { %v1268_v27 = vpop.f32.mrf.mxu0 }
 0x644   :  { %v2122_v44 = vpop.f32.mrf.mxu0 }
 0x646   :  { %v1278_v33 = vpop.f32.mrf.mxu0 }
 0x648   :  { %v2850_v52 = vpop.f32.mrf.mxu0 }
 0x64a   :  { %v2852_v28 = vpop.f32.mrf.mxu0 }
 0x64c   :  { %v2854_v29 = vpop.f32.mrf.mxu0 }
 0x64e   :  { %v2856_v24 = vpop.f32.mrf.mxu0 }
 0x650   :  { %v2131_v57 = vpop.f32.mrf.mxu0 }
 0x651   :  { %v1348_v31 = vadd.f32 %v2131_v57, %v2113_v22 }
 0x652   :  { %v1308_v32 = vpop.f32.mrf.mxu0 }
 0x653   :  { %v1347_v36 = vadd.f32 %v1308_v32, %v1248_v23 }
 0x654   :  { %v2134_v60 = vpop.f32.mrf.mxu0 }
 0x655   :  { %v1350_v37 = vadd.f32 %v2134_v60, %v2116_v48 }
 0x656   :  { %v1318_v2 = vpop.f32.mrf.mxu0 }
 0x657   :  { %v1349_v30 = vadd.f32 %v1318_v2, %v1258_v39  ;;  %v1829_v39 = vld [vmem:[%s2916_s5 + $0x20] sm:$0xff] }
 0x658   :  { %v2137_v45 = vpop.f32.mrf.mxu0 }
 0x659   :  { %v1380_v47 = vadd.f32 %v2137_v45, %v2119_v26  ;;  %v1354_v26 = vadd.f32 %v1350_v37, %v2585_v51 }
 0x65a   :  { %v1328_v63 = vpop.f32.mrf.mxu0 }
 0x65b   :  { %v1384_v16 = vadd.f32 %v2532_v34, %v1380_v47  ;;  %v1379_v12 = vadd.f32 %v1328_v63, %v1268_v27  ;;  %v1353_v27 = vadd.f32 %v1349_v30, %v2590_v53 }
 0x65c   :  { %v2140_v62 = vpop.f32.mrf.mxu0 }
 0x65d   :  { %v1820_v8 = vmul.f32 -1.442695, %v1384_v16  ;;  %v1383_v3 = vadd.f32 %v2537_v38, %v1379_v12  ;;  %v1382_v0 = vadd.f32 %v2140_v62, %v2122_v44  ;;  %v1352_v44 = vadd.f32 %v1348_v31, %v2598_v56 }
 0x65e   :  { %v1338_v46 = vpop.f32.mrf.mxu0  ;;  %v1817_v57 = vmul.f32 -1.442695, %v1353_v27 }
 0x65f   :  { %v1819_v9 = vmul.f32 -1.442695, %v1383_v3  ;;  %v1386_v13 = vadd.f32 %v2543_v43, %v1382_v0  ;;  %v1381_v6 = vadd.f32 %v1338_v46, %v1278_v33  ;;  %2261 = vpow2.f32 %v1820_v8 }
 0x660   :  { %v1818_v33 = vmul.f32 -1.442695, %v1354_v26 }
 0x661   :  { %v1822_v4 = vmul.f32 -1.442695, %v1386_v13  ;;  %v1385_v5 = vadd.f32 %v2549_v49, %v1381_v6  ;;  %2263 = vpow2.f32 %v1819_v9 }
 0x663   :  { %2265 = vpow2.f32 %v1822_v4  ;;  %v1821_v7 = vmul.f32 -1.442695, %v1385_v5 }
 0x665   :  { %2267 = vpow2.f32 %v1821_v7 }
 0x66c   :  { %v2262_v34 = vpop.eup %2261 }
 0x66d   :  { %v1400_v14 = vadd.f32 1.0, %v2262_v34 }
 0x66e   :  { %v2264_v10 = vpop.eup %2263 }
 0x66f   :  { %v1399_v17 = vadd.f32 1.0, %v2264_v10 }
 0x670   :  { %v2266_v11 = vpop.eup %2265 }
 0x671   :  { %v1402_v15 = vadd.f32 1.0, %v2266_v11 }
 0x672   :  { %v2268_v38 = vpop.eup %2267 }
 0x673   :  { %2269 = vrcp.f32 %v1402_v15  ;;  %v1401_v18 = vadd.f32 1.0, %v2268_v38 }
 0x674   :  { %2271 = vrcp.f32 %v1400_v14 }
 0x675   :  { %2273 = vrcp.f32 %v1401_v18 }
 0x676   :  { %2275 = vrcp.f32 %v1399_v17 }
 0x677   :  { %2277 = vpow2.f32 %v1818_v33 }
 0x678   :  { %2279 = vpow2.f32 %v1817_v57 }
 0x680   :  { %v2270_v43 = vpop.eup %2269 }
 0x681   :  { %v2272_v19 = vpop.eup %2271  ;;  %v1414_v49 = vmul.f32 %v2270_v43, %v2763_v61 }
 0x682   :  { %v2274_v20 = vpop.eup %2273  ;;  %v1412_v23 = vmul.f32 %v2272_v19, %v2772_v54  ;;  %v1828_v19 = vld [vmem:[%s2917_s4 + $0x28] sm:$0xff] }
 0x683   :  { %2141 = vmatprep.subr.mxu1 %v1414_v49  ;;  %v1413_v21 = vmul.f32 %v2274_v20, %v2767_v1  ;;  %v2276_v22 = vpop.eup %2275 }
 0x684   :  { %2142 = vmatpush3.msra.mxu1 %v1414_v49  ;;  %v1411_v48 = vmul.f32 %v2276_v22, %v2777_v58 }
 0x685   :  { %2143 = vmatprep.subr.mxu1 %v1413_v21 }
 0x686   :  { %2144 = vmatpush3.msra.mxu1 %v1413_v21 }
 0x687   :  { %2145 = vmatprep.subr.mxu1 %v1412_v23 }
 0x688   :  { %2146 = vmatpush3.msra.mxu1 %v1412_v23 }
 0x689   :  { %2147 = vmatprep.subr.mxu1 %v1411_v48 }
 0x68a   :  { %2148 = vmatpush3.msra.mxu1 %v1411_v48 }
 0x68b   :  { %2150 = vmatmul.mubr.msk.f32.vlgmr.msra.gmra.mxu1 %vm65_vm0, %v2560_v40  ;;  %v1351_v40 = vadd.f32 %v1347_v36, %v2606_v59 }
 0x68c   :  { %2152 = vmatprep.mubr.msk.f32.mxu1 %vm65_vm0, %v2565_v41  ;;  %v1816_v41 = vmul.f32 -1.442695, %v1352_v44 }
 0x68d   :  { %v1815_v32 = vmul.f32 -1.442695, %v1351_v40 }
 0x68e   :  { %2281 = vpow2.f32 %v1816_v41 }
 0x68f   :  { %2153 = vmatmul.mubr.msk.f32.gmra.mxu1 %vm65_vm0, %v2574_v42  ;;  %2283 = vpow2.f32 %v1815_v32  ;;  %v2278_v42 = vpop.eup %2277 }
 0x690   :  { %2163 = vmatprep.mubr.msk.f32.mxu1 %vm65_vm0, %v1829_v39  ;;  %v2280_v60 = vpop.eup %2279  ;;  %v1370_v45 = vadd.f32 1.0, %v2278_v42 }
 0x691   :  { %v1369_v37 = vadd.f32 1.0, %v2280_v60 }
 0x692   :  { %2285 = vrcp.f32 %v1370_v45 }
 0x693   :  { %2287 = vrcp.f32 %v1369_v37 }
 0x69b   :  { %v2282_v2 = vpop.eup %2281 }
 0x69c   :  { %v2284_v47 = vpop.eup %2283  ;;  %v1368_v56 = vadd.f32 1.0, %v2282_v2 }
 0x69d   :  { %v1367_v59 = vadd.f32 1.0, %v2284_v47 }
 0x69e   :  { %2289 = vrcp.f32 %v1368_v56 }
 0x69f   :  { %2291 = vrcp.f32 %v1367_v59 }
 0x74b   :  { %v2151_v51 = vpop.f32.mrf.mxu1 }
 0x74c   :  { %v1501_v53 = vadd.f32 %v2151_v51, %v2850_v52 }
 0x74d   :  { %v1481_v31 = vpop.f32.mrf.mxu1 }
 0x74e   :  { %v1500_v36 = vadd.f32 %v1481_v31, %v2852_v28  ;;  %v1505_v30 = vadd.f32 %v2613_v35, %v1501_v53  ;;  %v2286_v35 = vpop.eup %2285 }
 0x74f   :  { %v2154_v63 = vpop.f32.mrf.mxu1  ;;  %v2288_v28 = vpop.eup %2287  ;;  %v1515_v46 = vsub.f32 1.0, %v2286_v35 }
 0x750   :  { %v1503_v16 = vadd.f32 %v2154_v63, %v2854_v29  ;;  %v1504_v12 = vadd.f32 %v2618_v50, %v1500_v36  ;;  %2293 = vtanh.f32 %v1505_v30  ;;  %v2290_v0 = vpop.eup %2289  ;;  %v1514_v13 = vsub.f32 1.0, %v2288_v28 }
 0x751   :  { %v1491_v62 = vpop.f32.mrf.mxu1  ;;  %v2292_v29 = vpop.eup %2291  ;;  %v1519_v4 = vmul.f32 %v1515_v46, %v2763_v61  ;;  %v1513_v5 = vsub.f32 1.0, %v2290_v0 }
 0x752   :  { %v1507_v8 = vadd.f32 %v2624_v55, %v1503_v16  ;;  %v1502_v52 = vadd.f32 %v1491_v62, %v2856_v24  ;;  %v1512_v7 = vsub.f32 1.0, %v2292_v29 }
 0x753   :  { %v1517_v15 = vmul.f32 %v1513_v5, %v2772_v54  ;;  %v1827_v54 = vld [vmem:[%s2917_s4 + $0x20] sm:$0xff] }
 0x754   :  { %2295 = vtanh.f32 %v1507_v8  ;;  %v1506_v3 = vadd.f32 %v2630_v25, %v1502_v52  ;;  %v1518_v25 = vmul.f32 %v1514_v13, %v2767_v1  ;;  %v1516_v18 = vmul.f32 %v1512_v7, %v2777_v58  ;;  %v1830_v1 = vld [vmem:[%s2916_s5 + $0x28] sm:$0xff] }
 0x755   :  { %2297 = vtanh.f32 %v1504_v12 }
 0x756   :  { %2299 = vtanh.f32 %v1506_v3 }
 0x75d   :  { %v2294_v9 = vpop.eup %2293 }
 0x75e   :  { %v1521_v11 = vmul.f32 %v2294_v9, %v2290_v0 }
 0x760   :  { %v1525_v17 = vadd.f32 %v1521_v11, %v1517_v15 }
 0x761   :  { %v2296_v50 = vpop.eup %2295 }
 0x762   :  { %v2298_v6 = vpop.eup %2297  ;;  %v1523_v55 = vmul.f32 %v2296_v50, %v2286_v35 }
 0x763   :  { %v2300_v24 = vpop.eup %2299  ;;  %v1520_v38 = vmul.f32 %v2298_v6, %v2292_v29 }
 0x764   :  { %v1527_v34 = vadd.f32 %v1523_v55, %v1519_v4  ;;  %v1522_v10 = vmul.f32 %v2300_v24, %v2288_v28 }
 0x765   :  { %v1524_v61 = vadd.f32 %v1520_v38, %v1516_v18 }
 0x766   :  { %2155 = vmatprep.subr.mxu1 %v1527_v34  ;;  %v1526_v14 = vadd.f32 %v1522_v10, %v1518_v25 }
 0x767   :  { %2156 = vmatpush3.msra.mxu1 %v1527_v34 }
 0x768   :  { %2157 = vmatprep.subr.mxu1 %v1526_v14 }
 0x769   :  { %2158 = vmatpush3.msra.mxu1 %v1526_v14 }
 0x76a   :  { %2159 = vmatprep.subr.mxu1 %v1525_v17 }
 0x76b   :  { %2160 = vmatpush3.msra.mxu1 %v1525_v17 }
 0x76c   :  { %2161 = vmatprep.subr.mxu1 %v1524_v61 }
 0x76d   :  { %2162 = vmatpush3.msra.mxu1 %v1524_v61 }
 0x76e   :  { %2164 = vmatmul.mubr.msk.f32.vlgmr.msra.gmra.mxu1 %vm65_vm0, %v1830_v1 }
 0x76f   :  { %2170 = vmatprep.mubr.msk.f32.mxu1 %vm569_vm1, %v1827_v54 }
 0x82e   :  { %v2165_v43 = vpop.f32.mrf.mxu1 }
 0x82f   :  { %2166 = vmatprep.subr.mxu1 %v2165_v43 }
 0x830   :  { %v1606_v58 = vpop.f32.mrf.mxu1  ;;  %2167 = vmatpush3.msra.mxu1 %v2165_v43 }
 0x831   :  { %2168 = vmatprep.subr.mxu1 %v1606_v58 }
 0x832   :  { %2169 = vmatpush3.msra.mxu1 %v1606_v58 }
 0x833   :  { %2171 = vmatmul.mubr.msk.f32.vlgmr.msra.gmra.mxu1 %vm569_vm1, %v1828_v19 }
 0x8f3   :  { %v2172_v49 = vpop.f32.mrf.mxu1 }
 0x8f4   :  { %vm1697_vm6 = vcmp.ge.f32.partialorder %v2172_v49, 0.0  ;;  %v1699_v20 = vmul.f32 0.0, %v2172_v49 }
 0x8f5   :  { %v1687_v21 = vpop.f32.mrf.mxu1 }
 0x8f6   :  { %v1701_v22 = vsel %vm1697_vm6, %v2172_v49, %v1699_v20  ;;  %vm1696_vm7 = vcmp.ge.f32.partialorder %v1687_v21, 0.0  ;;  %v1698_v23 = vmul.f32 0.0, %v1687_v21 }
 0x8f7   :  { %1836 = vst.msk [vmem:[%s2918_s6 + $0x28] sm:$0xff] %vm569_vm1, %v1701_v22 }
 0x8f8   :  { %v1700_v48 = vsel %vm1696_vm7, %v1687_v21, %v1698_v23 }
 0x8f9   :  { %1835 = vst.msk [vmem:[%s2918_s6 + $0x20] sm:$0xff] %vm569_vm1, %v1700_v48 }

</bundles_post_ra>
